<compile_context>
chip_gen: v7x
topology: tpu7x:2x2x1
jax: 0.10.0
libtpu: 0.0.40
codegen_flags: <defaults>
</compile_context>

<pallas_src>
import functools
import math

import jax
import jax.numpy as jnp
import numpy as np
from jax.experimental import pallas as pl
from jax.experimental.pallas import tpu as pltpu


def _round_up(x, m):
    return ((x + m - 1) // m) * m


def _layernorm(x, gamma, beta, eps=1e-5):
    mu = jnp.mean(x, axis=-1, keepdims=True)
    var = jnp.mean((x - mu) ** 2, axis=-1, keepdims=True)  # biased, like nn.LayerNorm
    return (x - mu) * jax.lax.rsqrt(var + eps) * gamma + beta


# ----------------------------------------------------------------------------
# Fused kernel: input 1x1 conv -> num_layers encoder layers -> output 1x1 conv
# ----------------------------------------------------------------------------
def _fused_encoder_kernel(
    # layer-invariant inputs
    x_in_ref,      # (R, Cin)       bf16  packed, zero-padded point features
    attnbias_ref,  # (R, R)         f32   0 for same-batch valid key, else -1e30
    rowmask_ref,   # (R, 1)         f32   1 for valid rows, 0 for padding
    w_in_ref,      # (Cin, D)       bf16  input 1x1 Minkowski conv
    w_out_ref,     # (D, Cout_pad)  bf16  output 1x1 conv, lane-padded to 128
    # per-layer weights (leading layer axis == grid axis -> double-buffered)
    attnw_ref,     # (1, D, 4D)     bf16  [Wq | Wk | Wv | Wo] along lanes
    bias_ref,      # (1, 9, D)      f32   [bq,bk,bv,bo,b2,ln1g,ln1b,ln2g,ln2b]
    w1_ref,        # (1, D, F)      bf16
    b1_ref,        # (1, 1, F)      f32
    w2t_ref,       # (1, D, F)      bf16  W2 stored transposed (lane-dense)
    # output
    out_ref,       # (R, Cout_pad)  f32
    # scratch
    x_scr,         # (R, D)         f32   resident activations
    *, nhead, head_dim,
):
    layer = pl.program_id(0)
    d = nhead * head_dim
    scale = 1.0 / math.sqrt(head_dim)

    # ---- layer 0: fused input 1x1 Minkowski conv (per-point linear) --------
    @pl.when(layer == 0)
    def _():
        x_scr[...] = jnp.dot(x_in_ref[...], w_in_ref[...],
                             preferred_element_type=jnp.float32)

    x = x_scr[...]               # (R, D) f32, resident across layers
    rowmask = rowmask_ref[...]   # (R, 1) f32

    w_attn = attnw_ref[0]        # (D, 4D) bf16
    b = bias_ref[0]              # (9, D)  f32
    wo = w_attn[:, 3 * d:4 * d]  # (D, D)  bf16

    # ---- multi-head self attention ------------------------------------------
    # One full-row QKV projection: (R, D) @ (D, 3D)  (review fix: merged heads,
    # M = R rows, one MXU push instead of B*H tiny ones).
    xb = x.astype(jnp.bfloat16)
    qkv = jnp.dot(xb, w_attn[:, :3 * d],
                  preferred_element_type=jnp.float32)            # (R, 3D) f32

    attn_bias = attnbias_ref[...]                                # (R, R) f32
    ctx_heads = []
    for h in range(nhead):       # static unroll over heads (tiny, inherent K=hd)
        lo = h * head_dim
        hi = lo + head_dim
        qh = (qkv[:, lo:hi] + b[0:1, lo:hi]) * scale             # (R, hd)
        kh = qkv[:, d + lo:d + hi] + b[1:2, lo:hi]
        vh = qkv[:, 2 * d + lo:2 * d + hi] + b[2:3, lo:hi]
        # scores over all rows; block-diagonal bias confines attention to the
        # query's own batch and masks padded keys (finite -1e30, no NaNs).
        s = jax.lax.dot_general(qh, kh, (((1,), (1,)), ((), ())),
                                preferred_element_type=jnp.float32)  # (R, R)
        s = s + attn_bias
        s = s - jnp.max(s, axis=-1, keepdims=True)
        p = jnp.exp(s)
        p = p / jnp.sum(p, axis=-1, keepdims=True)               # exact softmax
        ctx_heads.append(jnp.dot(p, vh,
                                 preferred_element_type=jnp.float32))  # (R, hd)
    # heads merged along lanes (PyTorch concat order), then ONE K=D projection
    ctx = jnp.concatenate(ctx_heads, axis=-1)                    # (R, D)
    attn = jnp.dot(ctx.astype(jnp.bfloat16), wo,
                   preferred_element_type=jnp.float32) + b[3:4]  # (R, D)

    # ---- post-LN residual 1 + position-wise FFN over all R rows -------------
    x = _layernorm(x + attn, b[5:6], b[6:7]) * rowmask

    h1 = jnp.dot(x.astype(jnp.bfloat16), w1_ref[0],
                 preferred_element_type=jnp.float32) + b1_ref[0]
    h1 = jnp.maximum(h1, 0.0)                                    # ReLU
    # ff = h1 @ W2, with W2 stored transposed (D, F) so the streamed slab is
    # lane-dense; contraction on the minor dim of both operands (A @ B^T form).
    ff = jax.lax.dot_general(h1.astype(jnp.bfloat16), w2t_ref[0],
                             (((1,), (1,)), ((), ())),
                             preferred_element_type=jnp.float32) + b[4:5]

    x = _layernorm(x + ff, b[7:8], b[8:9]) * rowmask
    x_scr[...] = x

    # ---- last layer: fused output 1x1 conv, lane-dense (128-padded) store ---
    @pl.when(layer == pl.num_programs(0) - 1)
    def _():
        out_ref[...] = jnp.dot(x.astype(jnp.bfloat16), w_out_ref[...],
                               preferred_element_type=jnp.float32)


# ----------------------------------------------------------------------------
# pallas_call wrapper (jitted device path)
# ----------------------------------------------------------------------------
def _const_spec(shape):
    zeros = (0,) * len(shape)
    return pl.BlockSpec(shape, lambda l: zeros)


def _layer_spec(shape):
    zeros = (0,) * len(shape)
    return pl.BlockSpec((1,) + tuple(shape), lambda l: (l,) + zeros)


def _padded_bytes(shape, itemsize):
    """VMEM footprint of one buffer, padded to (sublane, 128) tiles."""
    s = list(shape)
    if len(s) < 2:
        s = [1] * (2 - len(s)) + s
    s[-1] = _round_up(int(s[-1]), 128)
    s[-2] = _round_up(int(s[-2]), 32 // itemsize)
    n = 1
    for v in s:
        n *= int(v)
    return n * itemsize


@functools.partial(jax.jit, static_argnames=("nhead", "head_dim"))
def _device_forward(features, row_idx, rowmask, attnbias, params, *,
                    nhead, head_dim):
    c_in, d = params["w_in"].shape
    c_out = params["w_out"].shape[1]
    c_out_pad = _round_up(c_out, 128)          # lane-dense output stores
    num_layers = params["attn_w"].shape[0]
    f = params["w1"].shape[2]
    r = rowmask.shape[0]

    # dense, zero-padded packing of the sparse point features (channels-last)
    x_dense = jnp.zeros((r, c_in), jnp.bfloat16).at[row_idx].set(
        features.astype(jnp.bfloat16))
    # zero-pad the output conv columns to the lane-padded width
    w_out_pad = jnp.zeros((d, c_out_pad), jnp.bfloat16).at[:, :c_out].set(
        params["w_out"])

    # VMEM budget computed from actual (tile-padded) buffer sizes (review fix 7)
    const_bytes = (_padded_bytes((r, c_in), 2) + _padded_bytes((r, r), 4)
                   + _padded_bytes((r, 1), 4) + _padded_bytes((c_in, d), 2)
                   + _padded_bytes((d, c_out_pad), 2))
    layer_bytes = (_padded_bytes((d, 4 * d), 2) + _padded_bytes((9, d), 4)
                   + _padded_bytes((d, f), 2) + _padded_bytes((1, f), 4)
                   + _padded_bytes((d, f), 2))
    io_scratch = _padded_bytes((r, c_out_pad), 4) + _padded_bytes((r, d), 4)
    temps = 4 * _padded_bytes((r, f), 4) + (nhead + 2) * _padded_bytes((r, r), 4)
    vmem_limit = int(min(100 * 2**20,
                         max(16 * 2**20,
                             2 * (const_bytes + 2 * layer_bytes + io_scratch)
                             + temps)))

    kernel = functools.partial(_fused_encoder_kernel,
                               nhead=nhead, head_dim=head_dim)

    out_dense = pl.pallas_call(
        kernel,
        out_shape=jax.ShapeDtypeStruct((r, c_out_pad), jnp.float32),
        grid_spec=pltpu.PrefetchScalarGridSpec(
            num_scalar_prefetch=0,
            grid=(num_layers,),
            in_specs=[
                _const_spec((r, c_in)),              # x_in
                _const_spec((r, r)),                 # block-diag key-pad bias
                _const_spec((r, 1)),                 # row validity mask
                _const_spec((c_in, d)),              # w_in
                _const_spec((d, c_out_pad)),         # w_out (lane-padded)
                _layer_spec((d, 4 * d)),             # [Wq|Wk|Wv|Wo] slab
                _layer_spec((9, d)),                 # packed small biases / LN
                _layer_spec((d, f)),                 # w1
                _layer_spec((1, f)),                 # b1
                _layer_spec((d, f)),                 # w2^T
            ],
            out_specs=pl.BlockSpec((r, c_out_pad), lambda l: (0, 0)),
            scratch_shapes=[pltpu.VMEM((r, d), jnp.float32)],
        ),
        compiler_params=pltpu.CompilerParams(
            dimension_semantics=("arbitrary",),      # layers are sequential
            vmem_limit_bytes=vmem_limit,
        ),
    )(
        x_dense, attnbias, rowmask, params["w_in"], w_out_pad,
        params["attn_w"], params["bias"],
        params["w1"], params["b1"], params["w2t"],
    )

    # gather valid rows back to the sparse layout and drop the lane padding
    return out_dense[row_idx, :c_out]


# ----------------------------------------------------------------------------
# Host-side packing metadata (one-time, outside the jitted hot path)
# ----------------------------------------------------------------------------
def build_packing_metadata(coords):
    bi = np.asarray(coords[:, 0]).astype(np.int64)
    # assert self.is_batch_dim_sorted(sinput.C)  (host-side, no device sync)
    assert np.all(bi[1:] >= bi[:-1]), "batch dimension must be sorted"
    counts = np.bincount(bi)
    offsets = np.cumsum(counts) - counts
    num_batches = int(counts.shape[0])
    seq_len = _round_up(max(int(counts.max()), 1), 8)   # sublane-aligned padding
    pos = np.arange(bi.shape[0]) - offsets[bi]
    row_idx = (bi * seq_len + pos).astype(np.int32)
    r = num_batches * seq_len

    valid = np.zeros((r,), np.float32)
    valid[row_idx] = 1.0
    rowmask = valid.reshape(r, 1)
    # block-diagonal additive attention bias: 0 iff (same batch AND valid key)
    row_batch = np.repeat(np.arange(num_batches), seq_len)
    same_batch = row_batch[:, None] == row_batch[None, :]
    key_valid = valid[None, :] > 0.5
    attnbias = np.where(same_batch & key_valid, 0.0, -1e30).astype(np.float32)
    return (jnp.asarray(row_idx), jnp.asarray(rowmask), jnp.asarray(attnbias),
            num_batches, seq_len)


def sparse_transformer_forward(coords, features, params, *, nhead, head_dim):
    row_idx, rowmask, attnbias, _, _ = build_packing_metadata(coords)
    return _device_forward(features, row_idx, rowmask, attnbias, params,
                           nhead=nhead, head_dim=head_dim)


# ----------------------------------------------------------------------------
# Parameters (deterministic synthetic init; weights bf16, biases/LN f32)
# Convention: q/k/v/out projections are applied as x @ W (+ b); heads occupy
# consecutive lane blocks [h*hd:(h+1)*hd], matching PyTorch's head concat order.
# W2 is stored transposed (D, F) so its streamed slab is lane-dense.
# ----------------------------------------------------------------------------
def init_params(key, input_dim, head_dim, num_layers, dim_feedforward=2048):
    nhead = input_dim // head_dim
    d = nhead * head_dim
    f = dim_feedforward

    def w(k, shape, fan_in):
        return (jax.random.normal(k, shape, jnp.float32)
                * (1.0 / math.sqrt(fan_in))).astype(jnp.bfloat16)

    ks = jax.random.split(key, 10)
    wq = w(ks[0], (num_layers, d, d), d)
    wk = w(ks[1], (num_layers, d, d), d)
    wv = w(ks[2], (num_layers, d, d), d)
    wo = w(ks[3], (num_layers, d, d), d)
    attn_w = jnp.concatenate([wq, wk, wv, wo], axis=2)          # (L, D, 4D)

    def brow(k, fan_in):
        return (jax.random.normal(k, (num_layers, 1, d), jnp.float32)
                * (1.0 / math.sqrt(fan_in)))

    kb = jax.random.split(ks[4], 5)
    bias = jnp.concatenate([
        brow(kb[0], d), brow(kb[1], d), brow(kb[2], d),          # bq, bk, bv
        brow(kb[3], d),                                          # bo
        brow(kb[4], f),                                          # b2
        jnp.ones((num_layers, 1, d), jnp.float32),               # ln1 gamma
        jnp.zeros((num_layers, 1, d), jnp.float32),              # ln1 beta
        jnp.ones((num_layers, 1, d), jnp.float32),               # ln2 gamma
        jnp.zeros((num_layers, 1, d), jnp.float32),               # ln2 beta
    ], axis=1)                                                    # (L, 9, D)

    params = {
        "w_in": w(ks[5], (input_dim, d), input_dim),
        "w_out": w(ks[6], (d, input_dim), d),
        "attn_w": attn_w,
        "bias": bias,
        "w1": w(ks[7], (num_layers, d, f), d),
        "b1": (jax.random.normal(ks[8], (num_layers, 1, f), jnp.float32)
               * (1.0 / math.sqrt(d))),
        "w2t": w(ks[9], (num_layers, d, f), f),    # W2^T, lane-dense
    }
    return params, nhead


# ----------------------------------------------------------------------------
# Demo
# ----------------------------------------------------------------------------
if __name__ == "__main__":
    input_dim = 32
    head_dim = 8
    num_layers = 2
    dim_feedforward = 2048  # nn.TransformerEncoderLayer default

    key = jax.random.PRNGKey(0)
    kp, kf, kc = jax.random.split(key, 3)
    params, nhead = init_params(kp, input_dim, head_dim, num_layers, dim_feedforward)

    # Synthetic sparse tensor: 2 batches with 16 and 9 points (sorted batch dim).
    counts = [16, 9]
    n_points = sum(counts)
    batch_col = np.concatenate(
        [np.full((c,), i, dtype=np.int32) for i, c in enumerate(counts)]
    )
    xyz = jax.random.randint(kc, (n_points, 3), 0, 16, dtype=jnp.int32)
    coords = jnp.concatenate([jnp.asarray(batch_col)[:, None], xyz], axis=1)  # (N, 4)
    features = jax.random.normal(kf, (n_points, input_dim), jnp.float32)      # (N, C)

    out = sparse_transformer_forward(
        coords, features, params, nhead=nhead, head_dim=head_dim
    )
    out = jax.block_until_ready(out)
    assert out.shape == (n_points, input_dim)
    assert bool(jnp.all(jnp.isfinite(out)))
    print("KERNEL_OK")
</pallas_src>

<mosaic_0001>
module attributes {stable_mosaic.version = 11 : i64} {
  func.func @_fused_encoder_kernel(%arg0: i32, %arg1: memref<32x32xbf16, #tpu.memory_space<vmem>>, %arg2: memref<32x32xf32, #tpu.memory_space<vmem>>, %arg3: memref<32x1xf32, #tpu.memory_space<vmem>>, %arg4: memref<32x32xbf16, #tpu.memory_space<vmem>>, %arg5: memref<32x128xbf16, #tpu.memory_space<vmem>>, %arg6: memref<1x32x128xbf16, #tpu.memory_space<vmem>>, %arg7: memref<1x9x32xf32, #tpu.memory_space<vmem>>, %arg8: memref<1x32x2048xbf16, #tpu.memory_space<vmem>>, %arg9: memref<1x1x2048xf32, #tpu.memory_space<vmem>>, %arg10: memref<1x32x2048xbf16, #tpu.memory_space<vmem>>, %arg11: memref<32x128xf32, #tpu.memory_space<vmem>>, %arg12: memref<32x32xf32, #tpu.memory_space<vmem>>) attributes {dimension_semantics = [#tpu.dimension_semantics<arbitrary>], iteration_bounds = array<i64: 2>, scalar_prefetch = 0 : i64, scratch_operands = 1 : i64, tpu.core_type = #tpu.core_type<tc>, window_params = [{pipeline_mode = #tpu.pipeline_mode<synchronous>, transform_indices = @transform_0, window_bounds = array<i64: 32, 32>}, {pipeline_mode = #tpu.pipeline_mode<synchronous>, transform_indices = @transform_1, window_bounds = array<i64: 32, 32>}, {pipeline_mode = #tpu.pipeline_mode<synchronous>, transform_indices = @transform_2, window_bounds = array<i64: 32, 1>}, {pipeline_mode = #tpu.pipeline_mode<synchronous>, transform_indices = @transform_3, window_bounds = array<i64: 32, 32>}, {pipeline_mode = #tpu.pipeline_mode<synchronous>, transform_indices = @transform_4, window_bounds = array<i64: 32, 128>}, {transform_indices = @transform_5, window_bounds = array<i64: 1, 32, 128>}, {transform_indices = @transform_6, window_bounds = array<i64: 1, 9, 32>}, {transform_indices = @transform_7, window_bounds = array<i64: 1, 32, 2048>}, {transform_indices = @transform_8, window_bounds = array<i64: 1, 1, 2048>}, {transform_indices = @transform_9, window_bounds = array<i64: 1, 32, 2048>}, {pipeline_mode = #tpu.pipeline_mode<synchronous>, transform_indices = @transform_10, window_bounds = array<i64: 32, 128>}]} {
    %c0_i32 = arith.constant 0 : i32
    %0 = arith.cmpi eq, %arg0, %c0_i32 : i32
    %1 = arith.extui %0 : i1 to i32
    %c0_i32_0 = arith.constant 0 : i32
    %2 = arith.cmpi ne, %1, %c0_i32_0 : i32
    scf.if %2 {
      %c0_58 = arith.constant 0 : index
      %c0_59 = arith.constant 0 : index
      %199 = vector.load %arg1[%c0_58, %c0_59] : memref<32x32xbf16, #tpu.memory_space<vmem>>, vector<32x32xbf16>
      %c0_60 = arith.constant 0 : index
      %c0_61 = arith.constant 0 : index
      %200 = vector.load %arg4[%c0_60, %c0_61] : memref<32x32xbf16, #tpu.memory_space<vmem>>, vector<32x32xbf16>
      %cst_62 = arith.constant dense<0.000000e+00> : vector<32x32xf32>
      %201 = tpu.matmul %199, %200, %cst_62 {dimension_numbers = #tpu.dot_dimension_numbers<[1], [0], [0], [1], [0, 0, 1, 1], [], []>} : vector<32x32xbf16>, vector<32x32xbf16>, vector<32x32xf32> -> vector<32x32xf32>
      %c0_63 = arith.constant 0 : index
      %c0_64 = arith.constant 0 : index
      %202 = vector.load %arg12[%c0_63, %c0_64] : memref<32x32xf32, #tpu.memory_space<vmem>>, vector<32x32xf32>
      tpu.vector_store %arg12[%c0_63, %c0_64], %201 {strides = array<i32>} : memref<32x32xf32, #tpu.memory_space<vmem>>, vector<32x32xf32>,
    } else {
    }
    %c0 = arith.constant 0 : index
    %c0_1 = arith.constant 0 : index
    %3 = vector.load %arg12[%c0, %c0_1] : memref<32x32xf32, #tpu.memory_space<vmem>>, vector<32x32xf32>
    %c0_2 = arith.constant 0 : index
    %c0_3 = arith.constant 0 : index
    %4 = vector.load %arg3[%c0_2, %c0_3] : memref<32x1xf32, #tpu.memory_space<vmem>>, vector<32x1xf32>
    %c0_4 = arith.constant 0 : index
    %c0_5 = arith.constant 0 : index
    %c0_6 = arith.constant 0 : index
    %5 = vector.load %arg6[%c0_4, %c0_5, %c0_6] : memref<1x32x128xbf16, #tpu.memory_space<vmem>>, vector<1x32x128xbf16>
    %6 = vector.shape_cast %5 : vector<1x32x128xbf16> to vector<32x128xbf16>
    %c0_7 = arith.constant 0 : index
    %c0_8 = arith.constant 0 : index
    %c0_9 = arith.constant 0 : index
    %7 = vector.load %arg7[%c0_7, %c0_8, %c0_9] : memref<1x9x32xf32, #tpu.memory_space<vmem>>, vector<1x9x32xf32>
    %8 = vector.shape_cast %7 : vector<1x9x32xf32> to vector<9x32xf32>
    %9 = vector.extract_strided_slice %6 {offsets = [0, 96], sizes = [32, 32], strides = [1, 1]} : vector<32x128xbf16> to vector<32x32xbf16>
    %10 = arith.truncf %3 : vector<32x32xf32> to vector<32x32xbf16>
    %11 = vector.extract_strided_slice %6 {offsets = [0, 0], sizes = [32, 96], strides = [1, 1]} : vector<32x128xbf16> to vector<32x96xbf16>
    %cst = arith.constant dense<0.000000e+00> : vector<32x96xf32>
    %12 = tpu.matmul %10, %11, %cst {dimension_numbers = #tpu.dot_dimension_numbers<[1], [0], [0], [1], [0, 0, 1, 1], [], []>} : vector<32x32xbf16>, vector<32x96xbf16>, vector<32x96xf32> -> vector<32x96xf32>
    %c0_10 = arith.constant 0 : index
    %c0_11 = arith.constant 0 : index
    %13 = vector.load %arg2[%c0_10, %c0_11] : memref<32x32xf32, #tpu.memory_space<vmem>>, vector<32x32xf32>
    %14 = vector.extract_strided_slice %12 {offsets = [0, 0], sizes = [32, 8], strides = [1, 1]} : vector<32x96xf32> to vector<32x8xf32>
    %15 = vector.extract_strided_slice %8 {offsets = [0, 0], sizes = [1, 8], strides = [1, 1]} : vector<9x32xf32> to vector<1x8xf32>
    %16 = vector.broadcast %15 : vector<1x8xf32> to vector<32x8xf32>
    %17 = arith.addf %14, %16 : vector<32x8xf32>
    %cst_12 = arith.constant 0.353553385 : f32
    %18 = vector.broadcast %cst_12 : f32 to vector<32x8xf32>
    %19 = arith.mulf %17, %18 : vector<32x8xf32>
    %20 = vector.extract_strided_slice %12 {offsets = [0, 32], sizes = [32, 8], strides = [1, 1]} : vector<32x96xf32> to vector<32x8xf32>
    %21 = vector.extract_strided_slice %8 {offsets = [1, 0], sizes = [1, 8], strides = [1, 1]} : vector<9x32xf32> to vector<1x8xf32>
    %22 = vector.broadcast %21 : vector<1x8xf32> to vector<32x8xf32>
    %23 = arith.addf %20, %22 : vector<32x8xf32>
    %24 = vector.extract_strided_slice %12 {offsets = [0, 64], sizes = [32, 8], strides = [1, 1]} : vector<32x96xf32> to vector<32x8xf32>
    %25 = vector.extract_strided_slice %8 {offsets = [2, 0], sizes = [1, 8], strides = [1, 1]} : vector<9x32xf32> to vector<1x8xf32>
    %26 = vector.broadcast %25 : vector<1x8xf32> to vector<32x8xf32>
    %27 = arith.addf %24, %26 : vector<32x8xf32>
    %cst_13 = arith.constant dense<0.000000e+00> : vector<32x32xf32>
    %28 = tpu.matmul %19, %23, %cst_13 {dimension_numbers = #tpu.dot_dimension_numbers<[1], [1], [0], [0], [0, 0, 1, 0], [], []>} : vector<32x8xf32>, vector<32x8xf32>, vector<32x32xf32> -> vector<32x32xf32>
    %29 = arith.addf %28, %13 : vector<32x32xf32>
    %cst_14 = arith.constant dense<0xFF800000> : vector<32xf32>
    %30 = vector.multi_reduction <maximumf>, %29, %cst_14 [1] : vector<32x32xf32> to vector<32xf32>
    %31 = vector.shape_cast %30 : vector<32xf32> to vector<32x1xf32>
    %32 = vector.broadcast %31 : vector<32x1xf32> to vector<32x32xf32>
    %33 = arith.subf %29, %32 : vector<32x32xf32>
    %34 = math.exp %33 : vector<32x32xf32>
    %cst_15 = arith.constant dense<0.000000e+00> : vector<32xf32>
    %35 = vector.multi_reduction <add>, %34, %cst_15 [1] : vector<32x32xf32> to vector<32xf32>
    %36 = vector.shape_cast %35 : vector<32xf32> to vector<32x1xf32>
    %37 = vector.broadcast %36 : vector<32x1xf32> to vector<32x32xf32>
    %38 = arith.divf %34, %37 : vector<32x32xf32>
    %cst_16 = arith.constant dense<0.000000e+00> : vector<32x8xf32>
    %39 = tpu.matmul %38, %27, %cst_16 {dimension_numbers = #tpu.dot_dimension_numbers<[1], [0], [0], [1], [0, 0, 1, 1], [], []>} : vector<32x32xf32>, vector<32x8xf32>, vector<32x8xf32> -> vector<32x8xf32>
    %40 = vector.extract_strided_slice %12 {offsets = [0, 8], sizes = [32, 8], strides = [1, 1]} : vector<32x96xf32> to vector<32x8xf32>
    %41 = vector.extract_strided_slice %8 {offsets = [0, 8], sizes = [1, 8], strides = [1, 1]} : vector<9x32xf32> to vector<1x8xf32>
    %42 = vector.broadcast %41 : vector<1x8xf32> to vector<32x8xf32>
    %43 = arith.addf %40, %42 : vector<32x8xf32>
    %cst_17 = arith.constant 0.353553385 : f32
    %44 = vector.broadcast %cst_17 : f32 to vector<32x8xf32>
    %45 = arith.mulf %43, %44 : vector<32x8xf32>
    %46 = vector.extract_strided_slice %12 {offsets = [0, 40], sizes = [32, 8], strides = [1, 1]} : vector<32x96xf32> to vector<32x8xf32>
    %47 = vector.extract_strided_slice %8 {offsets = [1, 8], sizes = [1, 8], strides = [1, 1]} : vector<9x32xf32> to vector<1x8xf32>
    %48 = vector.broadcast %47 : vector<1x8xf32> to vector<32x8xf32>
    %49 = arith.addf %46, %48 : vector<32x8xf32>
    %50 = vector.extract_strided_slice %12 {offsets = [0, 72], sizes = [32, 8], strides = [1, 1]} : vector<32x96xf32> to vector<32x8xf32>
    %51 = vector.extract_strided_slice %8 {offsets = [2, 8], sizes = [1, 8], strides = [1, 1]} : vector<9x32xf32> to vector<1x8xf32>
    %52 = vector.broadcast %51 : vector<1x8xf32> to vector<32x8xf32>
    %53 = arith.addf %50, %52 : vector<32x8xf32>
    %cst_18 = arith.constant dense<0.000000e+00> : vector<32x32xf32>
    %54 = tpu.matmul %45, %49, %cst_18 {dimension_numbers = #tpu.dot_dimension_numbers<[1], [1], [0], [0], [0, 0, 1, 0], [], []>} : vector<32x8xf32>, vector<32x8xf32>, vector<32x32xf32> -> vector<32x32xf32>
    %55 = arith.addf %54, %13 : vector<32x32xf32>
    %cst_19 = arith.constant dense<0xFF800000> : vector<32xf32>
    %56 = vector.multi_reduction <maximumf>, %55, %cst_19 [1] : vector<32x32xf32> to vector<32xf32>
    %57 = vector.shape_cast %56 : vector<32xf32> to vector<32x1xf32>
    %58 = vector.broadcast %57 : vector<32x1xf32> to vector<32x32xf32>
    %59 = arith.subf %55, %58 : vector<32x32xf32>
    %60 = math.exp %59 : vector<32x32xf32>
    %cst_20 = arith.constant dense<0.000000e+00> : vector<32xf32>
    %61 = vector.multi_reduction <add>, %60, %cst_20 [1] : vector<32x32xf32> to vector<32xf32>
    %62 = vector.shape_cast %61 : vector<32xf32> to vector<32x1xf32>
    %63 = vector.broadcast %62 : vector<32x1xf32> to vector<32x32xf32>
    %64 = arith.divf %60, %63 : vector<32x32xf32>
    %cst_21 = arith.constant dense<0.000000e+00> : vector<32x8xf32>
    %65 = tpu.matmul %64, %53, %cst_21 {dimension_numbers = #tpu.dot_dimension_numbers<[1], [0], [0], [1], [0, 0, 1, 1], [], []>} : vector<32x32xf32>, vector<32x8xf32>, vector<32x8xf32> -> vector<32x8xf32>
    %66 = vector.extract_strided_slice %12 {offsets = [0, 16], sizes = [32, 8], strides = [1, 1]} : vector<32x96xf32> to vector<32x8xf32>
    %67 = vector.extract_strided_slice %8 {offsets = [0, 16], sizes = [1, 8], strides = [1, 1]} : vector<9x32xf32> to vector<1x8xf32>
    %68 = vector.broadcast %67 : vector<1x8xf32> to vector<32x8xf32>
    %69 = arith.addf %66, %68 : vector<32x8xf32>
    %cst_22 = arith.constant 0.353553385 : f32
    %70 = vector.broadcast %cst_22 : f32 to vector<32x8xf32>
    %71 = arith.mulf %69, %70 : vector<32x8xf32>
    %72 = vector.extract_strided_slice %12 {offsets = [0, 48], sizes = [32, 8], strides = [1, 1]} : vector<32x96xf32> to vector<32x8xf32>
    %73 = vector.extract_strided_slice %8 {offsets = [1, 16], sizes = [1, 8], strides = [1, 1]} : vector<9x32xf32> to vector<1x8xf32>
    %74 = vector.broadcast %73 : vector<1x8xf32> to vector<32x8xf32>
    %75 = arith.addf %72, %74 : vector<32x8xf32>
    %76 = vector.extract_strided_slice %12 {offsets = [0, 80], sizes = [32, 8], strides = [1, 1]} : vector<32x96xf32> to vector<32x8xf32>
    %77 = vector.extract_strided_slice %8 {offsets = [2, 16], sizes = [1, 8], strides = [1, 1]} : vector<9x32xf32> to vector<1x8xf32>
    %78 = vector.broadcast %77 : vector<1x8xf32> to vector<32x8xf32>
    %79 = arith.addf %76, %78 : vector<32x8xf32>
    %cst_23 = arith.constant dense<0.000000e+00> : vector<32x32xf32>
    %80 = tpu.matmul %71, %75, %cst_23 {dimension_numbers = #tpu.dot_dimension_numbers<[1], [1], [0], [0], [0, 0, 1, 0], [], []>} : vector<32x8xf32>, vector<32x8xf32>, vector<32x32xf32> -> vector<32x32xf32>
    %81 = arith.addf %80, %13 : vector<32x32xf32>
    %cst_24 = arith.constant dense<0xFF800000> : vector<32xf32>
    %82 = vector.multi_reduction <maximumf>, %81, %cst_24 [1] : vector<32x32xf32> to vector<32xf32>
    %83 = vector.shape_cast %82 : vector<32xf32> to vector<32x1xf32>
    %84 = vector.broadcast %83 : vector<32x1xf32> to vector<32x32xf32>
    %85 = arith.subf %81, %84 : vector<32x32xf32>
    %86 = math.exp %85 : vector<32x32xf32>
    %cst_25 = arith.constant dense<0.000000e+00> : vector<32xf32>
    %87 = vector.multi_reduction <add>, %86, %cst_25 [1] : vector<32x32xf32> to vector<32xf32>
    %88 = vector.shape_cast %87 : vector<32xf32> to vector<32x1xf32>
    %89 = vector.broadcast %88 : vector<32x1xf32> to vector<32x32xf32>
    %90 = arith.divf %86, %89 : vector<32x32xf32>
    %cst_26 = arith.constant dense<0.000000e+00> : vector<32x8xf32>
    %91 = tpu.matmul %90, %79, %cst_26 {dimension_numbers = #tpu.dot_dimension_numbers<[1], [0], [0], [1], [0, 0, 1, 1], [], []>} : vector<32x32xf32>, vector<32x8xf32>, vector<32x8xf32> -> vector<32x8xf32>
    %92 = vector.extract_strided_slice %12 {offsets = [0, 24], sizes = [32, 8], strides = [1, 1]} : vector<32x96xf32> to vector<32x8xf32>
    %93 = vector.extract_strided_slice %8 {offsets = [0, 24], sizes = [1, 8], strides = [1, 1]} : vector<9x32xf32> to vector<1x8xf32>
    %94 = vector.broadcast %93 : vector<1x8xf32> to vector<32x8xf32>
    %95 = arith.addf %92, %94 : vector<32x8xf32>
    %cst_27 = arith.constant 0.353553385 : f32
    %96 = vector.broadcast %cst_27 : f32 to vector<32x8xf32>
    %97 = arith.mulf %95, %96 : vector<32x8xf32>
    %98 = vector.extract_strided_slice %12 {offsets = [0, 56], sizes = [32, 8], strides = [1, 1]} : vector<32x96xf32> to vector<32x8xf32>
    %99 = vector.extract_strided_slice %8 {offsets = [1, 24], sizes = [1, 8], strides = [1, 1]} : vector<9x32xf32> to vector<1x8xf32>
    %100 = vector.broadcast %99 : vector<1x8xf32> to vector<32x8xf32>
    %101 = arith.addf %98, %100 : vector<32x8xf32>
    %102 = vector.extract_strided_slice %12 {offsets = [0, 88], sizes = [32, 8], strides = [1, 1]} : vector<32x96xf32> to vector<32x8xf32>
    %103 = vector.extract_strided_slice %8 {offsets = [2, 24], sizes = [1, 8], strides = [1, 1]} : vector<9x32xf32> to vector<1x8xf32>
    %104 = vector.broadcast %103 : vector<1x8xf32> to vector<32x8xf32>
    %105 = arith.addf %102, %104 : vector<32x8xf32>
    %cst_28 = arith.constant dense<0.000000e+00> : vector<32x32xf32>
    %106 = tpu.matmul %97, %101, %cst_28 {dimension_numbers = #tpu.dot_dimension_numbers<[1], [1], [0], [0], [0, 0, 1, 0], [], []>} : vector<32x8xf32>, vector<32x8xf32>, vector<32x32xf32> -> vector<32x32xf32>
    %107 = arith.addf %106, %13 : vector<32x32xf32>
    %cst_29 = arith.constant dense<0xFF800000> : vector<32xf32>
    %108 = vector.multi_reduction <maximumf>, %107, %cst_29 [1] : vector<32x32xf32> to vector<32xf32>
    %109 = vector.shape_cast %108 : vector<32xf32> to vector<32x1xf32>
    %110 = vector.broadcast %109 : vector<32x1xf32> to vector<32x32xf32>
    %111 = arith.subf %107, %110 : vector<32x32xf32>
    %112 = math.exp %111 : vector<32x32xf32>
    %cst_30 = arith.constant dense<0.000000e+00> : vector<32xf32>
    %113 = vector.multi_reduction <add>, %112, %cst_30 [1] : vector<32x32xf32> to vector<32xf32>
    %114 = vector.shape_cast %113 : vector<32xf32> to vector<32x1xf32>
    %115 = vector.broadcast %114 : vector<32x1xf32> to vector<32x32xf32>
    %116 = arith.divf %112, %115 : vector<32x32xf32>
    %cst_31 = arith.constant dense<0.000000e+00> : vector<32x8xf32>
    %117 = tpu.matmul %116, %105, %cst_31 {dimension_numbers = #tpu.dot_dimension_numbers<[1], [0], [0], [1], [0, 0, 1, 1], [], []>} : vector<32x32xf32>, vector<32x8xf32>, vector<32x8xf32> -> vector<32x8xf32>
    %118 = tpu.concatenate %39, %65, %91, %117 in 1 : vector<32x8xf32>, vector<32x8xf32>, vector<32x8xf32>, vector<32x8xf32> -> vector<32x32xf32>
    %119 = arith.truncf %118 : vector<32x32xf32> to vector<32x32xbf16>
    %cst_32 = arith.constant dense<0.000000e+00> : vector<32x32xf32>
    %120 = tpu.matmul %119, %9, %cst_32 {dimension_numbers = #tpu.dot_dimension_numbers<[1], [0], [0], [1], [0, 0, 1, 1], [], []>} : vector<32x32xbf16>, vector<32x32xbf16>, vector<32x32xf32> -> vector<32x32xf32>
    %121 = vector.extract_strided_slice %8 {offsets = [3, 0], sizes = [1, 32], strides = [1, 1]} : vector<9x32xf32> to vector<1x32xf32>
    %122 = vector.broadcast %121 : vector<1x32xf32> to vector<32x32xf32>
    %123 = arith.addf %120, %122 : vector<32x32xf32>
    %124 = arith.addf %3, %123 : vector<32x32xf32>
    %125 = vector.extract_strided_slice %8 {offsets = [5, 0], sizes = [1, 32], strides = [1, 1]} : vector<9x32xf32> to vector<1x32xf32>
    %126 = vector.extract_strided_slice %8 {offsets = [6, 0], sizes = [1, 32], strides = [1, 1]} : vector<9x32xf32> to vector<1x32xf32>
    %cst_33 = arith.constant dense<0.000000e+00> : vector<32xf32>
    %127 = vector.multi_reduction <add>, %124, %cst_33 [1] : vector<32x32xf32> to vector<32xf32>
    %128 = vector.shape_cast %127 : vector<32xf32> to vector<32x1xf32>
    %cst_34 = arith.constant 3.200000e+01 : f32
    %129 = vector.broadcast %cst_34 : f32 to vector<32x1xf32>
    %130 = arith.divf %128, %129 : vector<32x1xf32>
    %131 = vector.broadcast %130 : vector<32x1xf32> to vector<32x32xf32>
    %132 = arith.subf %124, %131 : vector<32x32xf32>
    %133 = arith.mulf %132, %132 : vector<32x32xf32>
    %cst_35 = arith.constant dense<0.000000e+00> : vector<32xf32>
    %134 = vector.multi_reduction <add>, %133, %cst_35 [1] : vector<32x32xf32> to vector<32xf32>
    %135 = vector.shape_cast %134 : vector<32xf32> to vector<32x1xf32>
    %cst_36 = arith.constant 3.200000e+01 : f32
    %136 = vector.broadcast %cst_36 : f32 to vector<32x1xf32>
    %137 = arith.divf %135, %136 : vector<32x1xf32>
    %138 = vector.broadcast %130 : vector<32x1xf32> to vector<32x32xf32>
    %139 = arith.subf %124, %138 : vector<32x32xf32>
    %cst_37 = arith.constant 9.99999974E-6 : f32
    %140 = vector.broadcast %cst_37 : f32 to vector<32x1xf32>
    %141 = arith.addf %137, %140 : vector<32x1xf32>
    %142 = math.rsqrt %141 : vector<32x1xf32>
    %143 = vector.broadcast %142 : vector<32x1xf32> to vector<32x32xf32>
    %144 = arith.mulf %139, %143 : vector<32x32xf32>
    %145 = vector.broadcast %125 : vector<1x32xf32> to vector<32x32xf32>
    %146 = arith.mulf %144, %145 : vector<32x32xf32>
    %147 = vector.broadcast %126 : vector<1x32xf32> to vector<32x32xf32>
    %148 = arith.addf %146, %147 : vector<32x32xf32>
    %149 = vector.broadcast %4 : vector<32x1xf32> to vector<32x32xf32>
    %150 = arith.mulf %148, %149 : vector<32x32xf32>
    %151 = arith.truncf %150 : vector<32x32xf32> to vector<32x32xbf16>
    %c0_38 = arith.constant 0 : index
    %c0_39 = arith.constant 0 : index
    %c0_40 = arith.constant 0 : index
    %152 = vector.load %arg8[%c0_38, %c0_39, %c0_40] : memref<1x32x2048xbf16, #tpu.memory_space<vmem>>, vector<1x32x2048xbf16>
    %153 = vector.shape_cast %152 : vector<1x32x2048xbf16> to vector<32x2048xbf16>
    %cst_41 = arith.constant dense<0.000000e+00> : vector<32x2048xf32>
    %154 = tpu.matmul %151, %153, %cst_41 {dimension_numbers = #tpu.dot_dimension_numbers<[1], [0], [0], [1], [0, 0, 1, 1], [], []>} : vector<32x32xbf16>, vector<32x2048xbf16>, vector<32x2048xf32> -> vector<32x2048xf32>
    %c0_42 = arith.constant 0 : index
    %c0_43 = arith.constant 0 : index
    %c0_44 = arith.constant 0 : index
    %155 = vector.load %arg9[%c0_42, %c0_43, %c0_44] : memref<1x1x2048xf32, #tpu.memory_space<vmem>>, vector<1x1x2048xf32>
    %156 = vector.shape_cast %155 : vector<1x1x2048xf32> to vector<1x2048xf32>
    %157 = vector.broadcast %156 : vector<1x2048xf32> to vector<32x2048xf32>
    %158 = arith.addf %154, %157 : vector<32x2048xf32>
    %cst_45 = arith.constant 0.000000e+00 : f32
    %159 = vector.broadcast %cst_45 : f32 to vector<32x2048xf32>
    %160 = arith.maximumf %158, %159 : vector<32x2048xf32>
    %161 = arith.truncf %160 : vector<32x2048xf32> to vector<32x2048xbf16>
    %c0_46 = arith.constant 0 : index
    %c0_47 = arith.constant 0 : index
    %c0_48 = arith.constant 0 : index
    %162 = vector.load %arg10[%c0_46, %c0_47, %c0_48] : memref<1x32x2048xbf16, #tpu.memory_space<vmem>>, vector<1x32x2048xbf16>
    %163 = vector.shape_cast %162 : vector<1x32x2048xbf16> to vector<32x2048xbf16>
    %cst_49 = arith.constant dense<0.000000e+00> : vector<32x32xf32>
    %164 = tpu.matmul %161, %163, %cst_49 {dimension_numbers = #tpu.dot_dimension_numbers<[1], [1], [0], [0], [0, 0, 1, 0], [], []>} : vector<32x2048xbf16>, vector<32x2048xbf16>, vector<32x32xf32> -> vector<32x32xf32>
    %165 = vector.extract_strided_slice %8 {offsets = [4, 0], sizes = [1, 32], strides = [1, 1]} : vector<9x32xf32> to vector<1x32xf32>
    %166 = vector.broadcast %165 : vector<1x32xf32> to vector<32x32xf32>
    %167 = arith.addf %164, %166 : vector<32x32xf32>
    %168 = arith.addf %150, %167 : vector<32x32xf32>
    %169 = vector.extract_strided_slice %8 {offsets = [7, 0], sizes = [1, 32], strides = [1, 1]} : vector<9x32xf32> to vector<1x32xf32>
    %170 = vector.extract_strided_slice %8 {offsets = [8, 0], sizes = [1, 32], strides = [1, 1]} : vector<9x32xf32> to vector<1x32xf32>
    %cst_50 = arith.constant dense<0.000000e+00> : vector<32xf32>
    %171 = vector.multi_reduction <add>, %168, %cst_50 [1] : vector<32x32xf32> to vector<32xf32>
    %172 = vector.shape_cast %171 : vector<32xf32> to vector<32x1xf32>
    %cst_51 = arith.constant 3.200000e+01 : f32
    %173 = vector.broadcast %cst_51 : f32 to vector<32x1xf32>
    %174 = arith.divf %172, %173 : vector<32x1xf32>
    %175 = vector.broadcast %174 : vector<32x1xf32> to vector<32x32xf32>
    %176 = arith.subf %168, %175 : vector<32x32xf32>
    %177 = arith.mulf %176, %176 : vector<32x32xf32>
    %cst_52 = arith.constant dense<0.000000e+00> : vector<32xf32>
    %178 = vector.multi_reduction <add>, %177, %cst_52 [1] : vector<32x32xf32> to vector<32xf32>
    %179 = vector.shape_cast %178 : vector<32xf32> to vector<32x1xf32>
    %cst_53 = arith.constant 3.200000e+01 : f32
    %180 = vector.broadcast %cst_53 : f32 to vector<32x1xf32>
    %181 = arith.divf %179, %180 : vector<32x1xf32>
    %182 = vector.broadcast %174 : vector<32x1xf32> to vector<32x32xf32>
    %183 = arith.subf %168, %182 : vector<32x32xf32>
    %cst_54 = arith.constant 9.99999974E-6 : f32
    %184 = vector.broadcast %cst_54 : f32 to vector<32x1xf32>
    %185 = arith.addf %181, %184 : vector<32x1xf32>
    %186 = math.rsqrt %185 : vector<32x1xf32>
    %187 = vector.broadcast %186 : vector<32x1xf32> to vector<32x32xf32>
    %188 = arith.mulf %183, %187 : vector<32x32xf32>
    %189 = vector.broadcast %169 : vector<1x32xf32> to vector<32x32xf32>
    %190 = arith.mulf %188, %189 : vector<32x32xf32>
    %191 = vector.broadcast %170 : vector<1x32xf32> to vector<32x32xf32>
    %192 = arith.addf %190, %191 : vector<32x32xf32>
    %193 = vector.broadcast %4 : vector<32x1xf32> to vector<32x32xf32>
    %194 = arith.mulf %192, %193 : vector<32x32xf32>
    %c0_55 = arith.constant 0 : index
    %c0_56 = arith.constant 0 : index
    %195 = vector.load %arg12[%c0_55, %c0_56] : memref<32x32xf32, #tpu.memory_space<vmem>>, vector<32x32xf32>
    tpu.vector_store %arg12[%c0_55, %c0_56], %194 {strides = array<i32>} : memref<32x32xf32, #tpu.memory_space<vmem>>, vector<32x32xf32>,
    %c1_i32 = arith.constant 1 : i32
    %196 = arith.cmpi eq, %arg0, %c1_i32 : i32
    %197 = arith.extui %196 : i1 to i32
    %c0_i32_57 = arith.constant 0 : i32
    %198 = arith.cmpi ne, %197, %c0_i32_57 : i32
    scf.if %198 {
      %199 = arith.truncf %194 : vector<32x32xf32> to vector<32x32xbf16>
      %c0_58 = arith.constant 0 : index
      %c0_59 = arith.constant 0 : index
      %200 = vector.load %arg5[%c0_58, %c0_59] : memref<32x128xbf16, #tpu.memory_space<vmem>>, vector<32x128xbf16>
      %cst_60 = arith.constant dense<0.000000e+00> : vector<32x128xf32>
      %201 = tpu.matmul %199, %200, %cst_60 {dimension_numbers = #tpu.dot_dimension_numbers<[1], [0], [0], [1], [0, 0, 1, 1], [], []>} : vector<32x32xbf16>, vector<32x128xbf16>, vector<32x128xf32> -> vector<32x128xf32>
      %c0_61 = arith.constant 0 : index
      %c0_62 = arith.constant 0 : index
      %202 = vector.load %arg11[%c0_61, %c0_62] : memref<32x128xf32, #tpu.memory_space<vmem>>, vector<32x128xf32>
      tpu.vector_store %arg11[%c0_61, %c0_62], %201 {strides = array<i32>} : memref<32x128xf32, #tpu.memory_space<vmem>>, vector<32x128xf32>,
    } else {
    }
    return
  }
  func.func @transform_0(%arg0: i32) -> (i32, i32) {
    %c0_i32 = arith.constant 0 : i32
    %c0_i32_0 = arith.constant 0 : i32
    %c0_i32_1 = arith.constant 0 : i32
    return %c0_i32, %c0_i32_0 : i32, i32
  }
  func.func @transform_1(%arg0: i32) -> (i32, i32) {
    %c0_i32 = arith.constant 0 : i32
    %c0_i32_0 = arith.constant 0 : i32
    %c0_i32_1 = arith.constant 0 : i32
    return %c0_i32, %c0_i32_0 : i32, i32
  }
  func.func @transform_2(%arg0: i32) -> (i32, i32) {
    %c0_i32 = arith.constant 0 : i32
    %c0_i32_0 = arith.constant 0 : i32
    %c0_i32_1 = arith.constant 0 : i32
    return %c0_i32, %c0_i32_0 : i32, i32
  }
  func.func @transform_3(%arg0: i32) -> (i32, i32) {
    %c0_i32 = arith.constant 0 : i32
    %c0_i32_0 = arith.constant 0 : i32
    %c0_i32_1 = arith.constant 0 : i32
    return %c0_i32, %c0_i32_0 : i32, i32
  }
  func.func @transform_4(%arg0: i32) -> (i32, i32) {
    %c0_i32 = arith.constant 0 : i32
    %c0_i32_0 = arith.constant 0 : i32
    %c0_i32_1 = arith.constant 0 : i32
    return %c0_i32, %c0_i32_0 : i32, i32
  }
  func.func @transform_5(%arg0: i32) -> (i32, i32, i32) {
    %c0_i32 = arith.constant 0 : i32
    %c0_i32_0 = arith.constant 0 : i32
    %c0_i32_1 = arith.constant 0 : i32
    return %arg0, %c0_i32, %c0_i32_0 : i32, i32, i32
  }
  func.func @transform_6(%arg0: i32) -> (i32, i32, i32) {
    %c0_i32 = arith.constant 0 : i32
    %c0_i32_0 = arith.constant 0 : i32
    %c0_i32_1 = arith.constant 0 : i32
    return %arg0, %c0_i32, %c0_i32_0 : i32, i32, i32
  }
  func.func @transform_7(%arg0: i32) -> (i32, i32, i32) {
    %c0_i32 = arith.constant 0 : i32
    %c0_i32_0 = arith.constant 0 : i32
    %c0_i32_1 = arith.constant 0 : i32
    return %arg0, %c0_i32, %c0_i32_0 : i32, i32, i32
  }
  func.func @transform_8(%arg0: i32) -> (i32, i32, i32) {
    %c0_i32 = arith.constant 0 : i32
    %c0_i32_0 = arith.constant 0 : i32
    %c0_i32_1 = arith.constant 0 : i32
    return %arg0, %c0_i32, %c0_i32_0 : i32, i32, i32
  }
  func.func @transform_9(%arg0: i32) -> (i32, i32, i32) {
    %c0_i32 = arith.constant 0 : i32
    %c0_i32_0 = arith.constant 0 : i32
    %c0_i32_1 = arith.constant 0 : i32
    return %arg0, %c0_i32, %c0_i32_0 : i32, i32, i32
  }
  func.func @transform_10(%arg0: i32) -> (i32, i32) {
    %c0_i32 = arith.constant 0 : i32
    %c0_i32_0 = arith.constant 0 : i32
    %c0_i32_1 = arith.constant 0 : i32
    return %c0_i32, %c0_i32_0 : i32, i32
  }
}

</mosaic_0001>

<bundles_post_ra>
// kernel: custom-call
= control target key start
LH: loop header
LB: loop body
LE: loop exit
PB: predicated region body
PF: predicated region fallthrough
CT: control target
= control target key end

     0   :  { %s6_s0 = inlined_call_operand.hbm [shape: f32[25,32], index: 0, kind: output, shape index: {}]  }

// kernel: _device_forward.1
= control target key start
LH: loop header
LB: loop body
LE: loop exit
PB: predicated region body
PF: predicated region fallthrough
CT: control target
= control target key end

     0   :  { %s5516_s0 = inlined_call_operand.vmem [shape: bf16[32,32], index: 0, kind: input, shape index: {}]   ;;  %s5517_s1 = inlined_call_operand.vmem [shape: f32[32,32], index: 1, kind: input, shape index: {}]   ;;  %s5518_s2 = inlined_call_operand.vmem [shape: f32[32,1], index: 2, kind: input, shape index: {}]   ;;  %s5519_s3 = inlined_call_operand.vmem [shape: bf16[32,32], index: 3, kind: input, shape index: {}]   ;;  %s5520_s4 = inlined_call_operand.vmem [shape: bf16[32,128], index: 4, kind: input, shape index: {}]   ;;  %s5521_s5 = inlined_call_operand.vmem [shape: bf16[2,32,128], index: 5, kind: input, shape index: {}]   ;;  %s5522_s6 = inlined_call_operand.vmem [shape: f32[2,9,32], index: 6, kind: input, shape index: {}]   ;;  %s5523_s7 = inlined_call_operand.hbm [shape: bf16[2,32,2048], index: 7, kind: input, shape index: {}]   ;;  %s5524_s8 = inlined_call_operand.vmem [shape: f32[2,1,2048], index: 8, kind: input, shape index: {}]   ;;  %s5525_s9 = inlined_call_operand.hbm [shape: bf16[2,32,2048], index: 9, kind: input, shape index: {}]   ;;  %s5526_s10 = inlined_call_operand.vmem [shape: f32[32,128], index: 10, kind: output, shape index: {}]  }
   0x1   :  { %5529 = sst [smem:[#allocation10_spill]] %s5523_s7 }
   0x2   :  { %15 = vsyncpa [#allocation4], 0 }
   0x3   :  { %17 = vsyncpa [#allocation4 + $0x1], 0 }
   0x4   :  { %18 = vsyncpa [#allocation6], 0 }
   0x5   :  { %20 = vsyncpa [#allocation6 + $0x1], 0  ;;  %s4560_s13 = smov 0   ;;  %s4562_s14 = smov 0  }
   0x6   :  { %s4564_s15 = smov 0   ;;  %s4566_s16 = smov 0  }
   0x7 LB: > { %s4579_s17 = sadd.s32 4294967295, %s4483_s16   ;;  %s4582_s18 = sadd.s32 1, %s4483_s16   ;;  %s4483_s16 = sphi %s4566_s16, %s5544_s16   ;;  %s4479_s15 = sphi %s4564_s15, %s5543_s15   ;;  %s4475_s14 = sphi %s4562_s14, %s5542_s14   ;;  %s4471_s13 = sphi %s4560_s13, %s5541_s13  }
   0x8   : > { %s187_s19 = ssub.s32 %s4483_s16, %s4582_s18  ;;  %s190_s20 = sadd.s32 1, %s4479_s15 }
   0x9   : > { %p188_p0 = scmp.eq.s32.totalorder %s187_s19, 0  ;;  %p197_p1 = scmp.ne.s32.totalorder %s4479_s15, %s4475_s14 }
   0xa   : > { %p198_p2 = scmp.eq.s32.totalorder %s4483_s16, 0  ;;  %p203_p3 = scmp.ne.s32.totalorder %s4475_s14, %s4471_s13 }
   0xb   : > { %s4592_s21 = scalar_select %p188_p0, %s4479_s15, %s190_s20  }
   0xc   : > { %p199_p4 = por %p198_p2, %p197_p1  ;;  %p204_p5 = scmp.eq.s32.totalorder %s4579_s17, 0 }
   0xd   : > { %5530 = sst [smem:[#allocation9_spill]] %s4592_s21  ;;  %p4128_p6 = scmp.lt.s32.totalorder %s4483_s16, 2 }
   0xe   : > { %p4596_p7 = por %p204_p5, %p203_p3  ;;  %s4601_s23 = sand.u32 1, %s4479_s15  }
   0xf   : > { %s5527_s24 = sshll.u32 %s4601_s23, 8  ;;  %s3809_s25 = sshll.u32 %s4483_s16, 12 }
  0x10   : > { %s5531_s22 = scalar_select %p4596_p7, 1, 0 }
  0x11   : > { %s5532_s7 = sld [smem:[#allocation10_spill]]  ;;  %s335_s29 = scalar_lea.vmem [#allocation3], %s5527_s24 }
  0x12   : > { %s342_s30 = sshll.u32 %s335_s29, 4  ;;  %p4616_p8 = pnand %p4128_p6, %p199_p4  ;;  %s4614_s30 = int_to_ptr.vmem [resolvable:$true] %s342_s30 }
  0x13   : > { %s332_s12 = scalar_lea.sflag [#allocation4], %s4601_s23 }
  0x14   : > { %p4387_p11 = pneg %p4616_p8 }
  0x17   : > { %s4610_s28 = scalar_lea.hbm %s5532_s7, %s3809_s25  ;;  %s4390_s26 = scalar_lea.hbm %s5532_s7, 8192 }
  0x18   : > { %s4385_s13 = scalar_lea.hbm %s4610_s28, 4096  ;;  %p4391_p0 = scmp.lt.u32.totalorder %s4610_s28, %s5532_s7 }
  0x19   : > { %p4386_p10 = scmp.ne.s32.totalorder %s4610_s28, %s4385_s13  ;;  %p4392_p1 = scmp.lt.u32.totalorder %s4390_s26, %s4385_s13 }
  0x1a   : > { %p4394_p3 = scmp.lt.u32.totalorder %s4385_s13, %s4610_s28 }
  0x1b   : > { %p4388_p12 = pnand %p4387_p11, %p4386_p10  ;;  %p4393_p2 = por %p4392_p1, %p4391_p0 }
  0x1d   : > { %p4389_p13 = pneg %p4388_p12  ;;  %p4395_p4 = por %p4394_p3, %p4393_p2 }
  0x1f   : > { %p4396_p5 = pnand %p4395_p4, %p4389_p13 }
  0x21   : > { %4399 = shalt.err (!%p4396_p5)
}
  0x22   : > { %s4400_s24 = scalar_lea.vmem %s4614_s30, 4096  ;;  %s4485_s19 = smov [#allocation3]  }
  0x23   : > { %p4401_p6 = scmp.ne.s32.totalorder %s4614_s30, %s4400_s24  ;;  %s4405_s20 = sshll.u32 %s4485_s19, 4  ;;  %s4406_s20 = int_to_ptr.vmem [resolvable:$false] %s4405_s20 }
  0x24   : > { %s4407_s27 = scalar_lea.vmem %s4406_s20, 8192  ;;  %p4408_p9 = scmp.lt.s32.totalorder %s4614_s30, %s4406_s20 }
  0x25   : > { %p4403_p10 = pnand %p4401_p6, %p4387_p11  ;;  %p4409_p0 = scmp.lt.s32.totalorder %s4407_s27, %s4400_s24 }
  0x27   : > { %p4404_p12 = pneg %p4403_p10  ;;  %p4410_p1 = por %p4409_p0, %p4408_p9 }
  0x29   : > { %p4411_p2 = pnand %p4410_p1, %p4404_p12 }
  0x2b   : > { %4414 = shalt.err (!%p4411_p2)
}
  0x2c   : > { %s4486_s13 = smov 1024   ;;  %s4487_s26 = smov 64  }
  0x2d   : > { %4124 = dma.hbm_to_vmem [thread:$0]  (!%p4616_p8), %s4610_s28, 4096, %s4614_s30, %s332_s12, %s4486_s13, %s4486_s13, %s4487_s26  }
  0x2e   : > { %p378_p9 = scmp.lt.s32.totalorder %s4483_s16, 3  ;;  %s4658_s19 = scalar_lea.hbm %s5525_s9, %s3809_s25 }
  0x2f   : > { %p5534_p13 = scmp.ge.s32.totalorder %s4483_s16, 1  ;;  %s5536_s27 = sshll.u32 %s4601_s23, 8 }
  0x30   : > { %s363_s7 = scalar_lea.vmem [#allocation5], %s5536_s27  ;;  %s360_s28 = scalar_lea.sflag [#allocation6], %s4601_s23 }
  0x31   : > { %p4662_p3 = pnand %p5534_p13, %p378_p9  ;;  %s370_s21 = sshll.u32 %s363_s7, 4  ;;  %s4668_s21 = int_to_ptr.vmem [resolvable:$true] %s370_s21 }
  0x32   : > { %s4415_s30 = scalar_lea.hbm %s4658_s19, 4096  ;;  %s4420_s12 = scalar_lea.hbm %s5525_s9, 8192 }
  0x33   : > { %p4416_p4 = scmp.ne.s32.totalorder %s4658_s19, %s4415_s30  ;;  %p4421_p10 = scmp.lt.u32.totalorder %s4658_s19, %s5525_s9 }
  0x34   : > { %p4422_p12 = scmp.lt.u32.totalorder %s4420_s12, %s4415_s30  ;;  %p4424_p1 = scmp.lt.u32.totalorder %s4415_s30, %s4658_s19 }
  0x35   : > { %p4418_p5 = pnand %p4416_p4, %p4387_p11 }
  0x36   : > { %p4423_p0 = por %p4422_p12, %p4421_p10 }
  0x37   : > { %p4419_p6 = pneg %p4418_p5 }
  0x38   : > { %p4425_p2 = por %p4424_p1, %p4423_p0 }
  0x3a   : > { %p4426_p9 = pnand %p4425_p2, %p4419_p6 }
  0x3c   : > { %4429 = shalt.err (!%p4426_p9)
}
  0x3d   : > { %s4430_s7 = scalar_lea.vmem %s4668_s21, 4096  ;;  %s4488_s27 = smov [#allocation5]  }
  0x3e   : > { %p4431_p13 = scmp.ne.s32.totalorder %s4668_s21, %s4430_s7  ;;  %s4435_s16 = sshll.u32 %s4488_s27, 4  ;;  %s4436_s16 = int_to_ptr.vmem [resolvable:$false] %s4435_s16 }
  0x3f   : > { %s4437_s25 = scalar_lea.vmem %s4436_s16, 8192  ;;  %p4438_p7 = scmp.lt.s32.totalorder %s4668_s21, %s4436_s16 }
  0x40   : > { %p4433_p4 = pnand %p4431_p13, %p4387_p11  ;;  %p4439_p10 = scmp.lt.s32.totalorder %s4437_s25, %s4430_s7 }
  0x42   : > { %p4434_p5 = pneg %p4433_p4  ;;  %p4440_p12 = por %p4439_p10, %p4438_p7 }
  0x44   : > { %p4441_p0 = pnand %p4440_p12, %p4434_p5 }
  0x46   : > { %4444 = shalt.err (!%p4441_p0)
}
  0x47   : > { %4127 = dma.hbm_to_vmem [thread:$0]  (!%p4616_p8), %s4658_s19, 4096, %s4668_s21, %s360_s28, %s4486_s13, %s4486_s13, %s4487_s26  }
  0x48   : > { %382 = sbr.rel (%p4662_p3) target bundleno = 4883 (0x1313), region = 60  ;;  %s384_s30 = sand.u32 (!%p4662_p3), 1, %s4475_s14  }
  0x49   : > { %s3653_s12 = sshll.u32 (!%p4662_p3), %s384_s30, 8  ;;  %s385_s24 = scalar_lea.sflag (!%p4662_p3), [#allocation4], %s384_s30 }
  0x4a   : > { %s4702_s29 = scalar_lea.vmem (!%p4662_p3), [#allocation3], %s3653_s12  ;;  %p5537_p7 = scmp.ne.s32.totalorder (!%p4662_p3), %s5531_s22, 0 }
  0x4f   : > { %4462 = dma.done.wait (%p5537_p7), %s385_s24, 4096  }
  0x50   : > { %4464 = vsyncadd (%p5537_p7), %s385_s24, 4294963200  ;;  %s394_s23 = scalar_lea.sflag [#allocation6], %s384_s30  ;;  %s4708_s11 = scalar_lea.vmem [#allocation5], %s3653_s12 }
  0x51   : > { %4466 = dma.done.wait (%p5537_p7), %s394_s23, 4096  }
  0x52   : > { %4468 = vsyncadd (%p5537_p7), %s394_s23, 4294963200  ;;  %p448_p8 = scmp.lt.s32.totalorder %s4579_s17, 1  ;;  %p3660_p11 = scmp.ne.s32.totalorder %s4579_s17, 0 }
  0x53   : > { %v4179_v0 = vld [vmem:[%s5519_s3] sm:$0xff] (!%p3660_p11)   ;;  %v4180_v1 = vld [vmem:[%s5519_s3 + $0x8] sm:$0xff] (!%p3660_p11)   ;;  %vm497_vm0 = vcmask (!%p3660_p11), 261120  }
  0x54   : > { %s449_s21 = scalar_select %p448_p8, %s4579_s17, 1 }
  0x55   : > { %466 = sbr.rel (%p3660_p11) target bundleno = 309 (0x135), region = 72  ;;  %3893 = vmatprep.subr.bf16.mxu0 (!%p3660_p11), %v4179_v0  ;;  %v4181_v2 = vld [vmem:[%s5516_s0] sm:$0xff] (!%p3660_p11)   ;;  %v4182_v3 = vld [vmem:[%s5516_s0 + $0x8] sm:$0xff] (!%p3660_p11)  }
  0x56   : > { %s3811_s13 = sshll.u32 %s449_s21, 4  ;;  %3894 = vmatpush3.bf16.msra.mxu0 (!%p3660_p11), %v4179_v0  ;;  %3897 = vmatprep.mubr.msk.bf16.mxu0 (!%p3660_p11), %vm497_vm0, %v4181_v2 }
  0x57   : > { %s452_s20 = scalar_lea.vmem %s5521_s5, %s3811_s13  ;;  %s4722_s27 = scalar_lea.vmem %s5522_s6, %s3811_s13  ;;  %3895 = vmatprep.subr.bf16.mxu0 (!%p3660_p11), %v4180_v1 }
  0x58   : > { %s4727_s30 = scalar_lea.vmem %s5524_s8, %s3811_s13 }
  0x5a   : > { %3896 = vmatpush3.bf16.msra.mxu0 (!%p3660_p11), %v4180_v1 }
  0x5d   : > { %3898 = vmatmul.mubr.msk.bf16.vlgmr.msra.gmra.mrb[0].mxu0 %vm497_vm0, %v4182_v3 }
 0x130   : > { %v3899_v4 = vpop.f32.mrb[0].mxu0 }
 0x131   : > { %555 = vst.msk [vmem:[#allocation2 + $0x10] sm:$0xff] %vm497_vm0, %v3899_v4  ;;  %v538_v5 = vpop.f32.mrb[1].mxu0 }
 0x132   : > { %553 = vst.msk [vmem:[#allocation2] sm:$0xff] %vm497_vm0, %v538_v5  ;;  %v3900_v6 = vpop.f32.mrb[2].mxu0 }
 0x133   : > { %556 = vst.msk [vmem:[#allocation2 + $0x18] sm:$0xff] %vm497_vm0, %v3900_v6  ;;  %v541_v7 = vpop.f32.mrb[3].mxu0 }
 0x134   : > { %554 = vst.msk [vmem:[#allocation2 + $0x8] sm:$0xff] %vm497_vm0, %v541_v7 }
 0x135 PF: > { %v4748_v8 = vld [vmem:[%s452_s20] sm:$0xff]   ;;  %v645_v9 = vlaneseq  ;;  %v4750_v10 = vld [vmem:[%s452_s20 + $0x8] sm:$0xff]   ;;  %vm585_vm1 = vcmask 261120   ;;  %s4489_s20 = smov 32   ;;  %vm693_vm2 = vcmask 64512   ;;  %s4490_s28 = smov 96  }
 0x136   : > { %3901 = vmatprep.subr.bf16.mxu0 %v4748_v8  ;;  %v4757_v17 = vld [vmem:[%s4722_s27] sm:$0xff]  ;;  %vm4798_vm3 = vmpackc.low %vm693_vm2, %vm693_vm2  ;;  %v4825_v51 = vld [vmem:[%s5517_s1 + $0x8] sm:$0xff]  ;;  %s4491_s26 = smov 64   ;;  %s4492_s13 = smov 88   ;;  %vm1818_vm4 = vcmask 130048   ;;  %vm1823_vm5 = vcmask 195584  }
 0x137   : > { %v4753_v13 = vshrl.u32 %v645_v9, 7  ;;  %3902 = vmatpush3.bf16.msra.mxu0 %v4748_v8  ;;  %v4830_v52 = vld [vmem:[%s5517_s1] sm:$0xff]  ;;  %v4837_v57 = vld [vmem:[%s5517_s1 + $0x18] sm:$0xff]  ;;  %v4843_v59 = vld [vmem:[%s5517_s1 + $0x10] sm:$0xff]  ;;  %s4493_s19 = smov 120   ;;  %s4495_s7 = smov 80  }
 0x138   : > { %v559_v15 = vld [vmem:[#allocation2 + $0x10] sm:$0xff]  ;;  %3903 = vmatprep.subr.bf16.mxu0 %v4750_v10  ;;  %s4496_s16 = smov 112   ;;  %s4497_s25 = smov 48  }
 0x139   : > { %v557_v11 = vld [vmem:[#allocation2] sm:$0xff]  ;;  %v4761_v18 = vsub.s32 1, %v4753_v13  ;;  %v4770_v21 = vsub.s32 0, %v4753_v13  ;;  %v4851_v3 = vsub.s32 2, %v4753_v13  ;;  %s4498_s22 = smov 72   ;;  %s4499_s12 = smov 104  }
 0x13a   : > { %v560_v16 = vld [vmem:[#allocation2 + $0x18] sm:$0xff]  ;;  %s4500_s24 = smov 40   ;;  %s4501_s23 = smov 8  }
 0x13b   : > { %v558_v12 = vld [vmem:[#allocation2 + $0x8] sm:$0xff]  ;;  %v572_v19 = vpack.c.bf16 %v560_v16, %v559_v15  ;;  %v660_v20 = vrot.slane %v4757_v17, %v4761_v18  ;;  %3904 = vmatpush3.bf16.msra.mxu0 %v4750_v10  ;;  %v648_v22 = vrot.slane %v4757_v17, %v4770_v21  ;;  %v672_v4 = vrot.slane %v4757_v17, %v4851_v3  ;;  %s4502_s21 = smov 16   ;;  %p3802_p3 = scmp.ne.s32.totalorder %s4579_s17, 1 }
 0x13c   : > { %v571_v14 = vpack.c.bf16 %v558_v12, %v557_v11 }
 0x13d   : > { %662 = vrot.lane.b32.xlu0 %v660_v20, %s4489_s20 }
 0x13e   : > { %3905 = vmatprep.mubr.msk.bf16.mxu0 %vm585_vm1, %v571_v14 }
 0x13f   : > { %3906 = vmatmul.mubr.msk.bf16.vlgmr.msra.gmra.mrb[0].mxu0 %vm585_vm1, %v572_v19 }
 0x1af   : > { %v663_v23 = vpop.permute.xlu0 %662 }
 0x212   : > { %v4774_v24 = vpop.f32.mrb[0].mxu0 }
 0x213   : > { %v651_v25 = vadd.f32 %v4774_v24, %v648_v22  ;;  %v4777_v26 = vpop.f32.mrb[1].mxu0  ;;  %v667_v29 = vadd.f32 %v4774_v24, %v663_v23 }
 0x214   : > { %v649_v27 = vadd.f32 %v648_v22, %v4777_v26  ;;  %v4780_v28 = vpop.f32.mrb[2].mxu0  ;;  %v665_v34 = vadd.f32 %v663_v23, %v4777_v26 }
 0x215   : > { %v652_v30 = vadd.f32 %v4780_v28, %v648_v22  ;;  %v668_v31 = vadd.f32 %v4780_v28, %v663_v23  ;;  %v629_v32 = vpop.f32.mrb[3].mxu0  ;;  %v4812_v49 = vmul.f32 0.35355338, %v651_v25 }
 0x216   : > { %v4785_v33 = vmul.f32 0.35355338, %v649_v27  ;;  %v650_v35 = vadd.f32 %v648_v22, %v629_v32  ;;  %v666_v36 = vadd.f32 %v663_v23, %v629_v32 }
 0x217   : > { %v4788_v37 = vpack.i.bf16 %v668_v31, %v667_v29  ;;  %v4818_v50 = vmul.f32 0.35355338, %v652_v30 }
 0x218   : > { %3917 = vmatprep.mubr.msk.f32.mxu1 %vm693_vm2, %v4785_v33  ;;  %v4792_v38 = vpack.i.bf16 %v666_v36, %v665_v34  ;;  %v4810_v48 = vmul.f32 0.35355338, %v650_v35 }
 0x219   : > { %4189 = vrot.lane.b32.xlu1 %v4788_v37, %s4490_s28 }
 0x21a   : > { %4184 = vrot.lane.b32.xlu0 %v4792_v38, %s4490_s28  ;;  %s4494_s28 = smov 56  }
 0x28b   : > { %v4190_v39 = vpop.permute.xlu1 %4189 }
 0x28c   : > { %v4185_v40 = vpop.permute.xlu0 %4184  ;;  %v4192_v41 = vunpack.i.h.bf16 %v4190_v39  ;;  %v4191_v42 = vunpack.i.l.bf16 %v4190_v39 }
 0x28d   : > { %v4187_v43 = vunpack.i.h.bf16 %v4185_v40  ;;  %v4186_v44 = vunpack.i.l.bf16 %v4185_v40 }
 0x28e   : > { %v4043_v47 = vpack.c.bf16 %v4192_v41, %v4191_v42 }
 0x28f   : > { %v4037_v46 = vpack.c.bf16 %v4187_v43, %v4186_v44 }
 0x291   : > { %4039 = vmatprep.subr.msk.bf16.mxu1 %vm4798_vm3, %v4037_v46 }
 0x292   : > { %4042 = vmatpush3.bf16.xpose.msk.msra.mxu1 %vm4798_vm3, %v4037_v46 }
 0x293   : > { %4045 = vmatprep.subr.msk.bf16.mxu1 %vm4798_vm3, %v4043_v47 }
 0x29a   : > { %4048 = vmatpush3.bf16.xpose.msk.msra.mxu1 %vm4798_vm3, %v4043_v47 }
 0x2a1   : > { %3918 = vmatmul.mubr.msk.f32.vlgmr.msra.gmra.mrb[0].mxu1 %vm693_vm2, %v4810_v48 }
 0x2a2   : > { %3920 = vmatprep.mubr.msk.f32.mxu1 %vm693_vm2, %v4812_v49 }
 0x2a5   : > { %3921 = vmatmul.mubr.msk.f32.gmra.mrb[2].mxu1 %vm693_vm2, %v4818_v50 }
 0x374   : > { %v3919_v53 = vpop.f32.mrb[0].mxu1 }
 0x375   : > { %v786_v54 = vadd.f32 %v3919_v53, %v4825_v51  ;;  %v780_v55 = vpop.f32.mrb[1].mxu1 }
 0x376   : > { %v781_v56 = vadd.f32 %v780_v55, %v4830_v52 }
 0x377   : > { %v802_v58 = vsel %vm585_vm1, %v786_v54, -inf }
 0x378   : > { %803 = vmax.xlane.f32.xlu0 %v802_v58  ;;  %v3922_v60 = vpop.f32.mrb[2].mxu1  ;;  %v799_v61 = vsel %vm585_vm1, %v781_v56, -inf }
 0x379   : > { %v796_v62 = vadd.f32 %v3922_v60, %v4837_v57  ;;  %v790_v63 = vpop.f32.mrb[3].mxu1  ;;  %800 = vmax.xlane.f32.xlu1 %v799_v61 }
 0x37a   : > { %v791_v0 = vadd.f32 %v790_v63, %v4843_v59 }
 0x37b   : > { %v808_v1 = vsel %vm585_vm1, %v796_v62, -inf }
 0x37c   : > { %v805_v2 = vsel %vm585_vm1, %v791_v0, -inf }
 0x37d   : > { %806 = vmax.xlane.f32.xlu0 %v805_v2  ;;  %809 = vmax.xlane.f32.xlu1 %v808_v1 }
 0x393   : > { %674 = vrot.lane.b32.xlu0 %v672_v4, %s4491_s26 }
 0x405   : > { %v804_v5 = vpop.xlane.xlu0 %803 }
 0x406   : > { %v801_v17 = vpop.xlane.xlu1 %800  ;;  %v812_v19 = vsub.f32 %v786_v54, %v804_v5 }
 0x407   : > { %v811_v22 = vsub.f32 %v781_v56, %v801_v17 }
 0x408   : > { %v817_v20 = vmul.f32 1.442695, %v812_v19 }
 0x40a   : > { %v807_v6 = vpop.xlane.xlu0 %806  ;;  %v810_v23 = vpop.xlane.xlu1 %809  ;;  %4297 = vpow2.f32 %v817_v20 }
 0x40b   : > { %v814_v25 = vsub.f32 %v796_v62, %v810_v23 }
 0x40d   : > { %v821_v27 = vmul.f32 1.442695, %v814_v25 }
 0x40e   : > { %v675_v7 = vpop.permute.xlu0 %674 }
 0x40f   : > { %v677_v9 = vadd.f32 %v675_v7, %v4777_v26  ;;  %v678_v11 = vadd.f32 %v675_v7, %v629_v32  ;;  %v679_v12 = vadd.f32 %v4774_v24, %v675_v7  ;;  %v680_v14 = vadd.f32 %v4780_v28, %v675_v7 }
 0x410   : > { %v815_v24 = vmul.f32 1.442695, %v811_v22  ;;  %v813_v26 = vsub.f32 %v791_v0, %v807_v6 }
 0x411   : > { %v4858_v15 = vpack.i.bf16 %v678_v11, %v677_v9  ;;  %v4860_v16 = vpack.i.bf16 %v680_v14, %v679_v12 }
 0x412   : > { %4299 = vpow2.f32 %v815_v24  ;;  %v819_v28 = vmul.f32 1.442695, %v813_v26 }
 0x413   : > { %4194 = vrot.lane.b32.xlu1 %v4858_v15, %s4491_s26  ;;  %4199 = vrot.lane.b32.xlu0 %v4860_v16, %s4491_s26  ;;  %4301 = vpow2.f32 %v821_v27 }
 0x414   : > { %v4298_v29 = vpop.eup %4297  ;;  %4303 = vpow2.f32 %v819_v28 }
 0x415   : > { %v826_v30 = vsel %vm585_vm1, %v4298_v29, 0.0 }
 0x417   : > { %4204 = vrot.lane.b32.xlu0 %v4792_v38, %s4492_s13 }
 0x41b   : > { %4209 = vrot.lane.b32.xlu0 %v4788_v37, %s4492_s13 }
 0x41c   : > { %v4300_v31 = vpop.eup %4299 }
 0x41d   : > { %v823_v32 = vsel %vm585_vm1, %v4300_v31, 0.0  ;;  %v4302_v34 = vpop.eup %4301 }
 0x41e   : > { %v832_v35 = vsel %vm585_vm1, %v4302_v34, 0.0  ;;  %v4304_v36 = vpop.eup %4303 }
 0x41f   : > { %956 = vrot.lane.b32.xlu0 %v4785_v33, %s4493_s19  ;;  %v829_v39 = vsel %vm585_vm1, %v4304_v36, 0.0 }
 0x423   : > { %960 = vrot.lane.b32.xlu0 %v4812_v49, %s4493_s19 }
 0x437   : > { %827 = vadd.xlane.f32.xlu1 %v826_v30 }
 0x43b   : > { %824 = vadd.xlane.f32.xlu1 %v823_v32 }
 0x43f   : > { %833 = vadd.xlane.f32.xlu1 %v832_v35 }
 0x443   : > { %830 = vadd.xlane.f32.xlu1 %v829_v39 }
 0x454   : > { %958 = vrot.lane.b32.xlu1 %v4810_v48, %s4493_s19 }
 0x458   : > { %962 = vrot.lane.b32.xlu1 %v4818_v50, %s4493_s19 }
 0x485   : > { %v4195_v40 = vpop.permute.xlu1 %4194  ;;  %v4200_v41 = vpop.permute.xlu0 %4199 }
 0x486   : > { %v4197_v42 = vunpack.i.h.bf16 %v4195_v40  ;;  %v4196_v43 = vunpack.i.l.bf16 %v4195_v40  ;;  %v4202_v44 = vunpack.i.h.bf16 %v4200_v41  ;;  %v4201_v46 = vunpack.i.l.bf16 %v4200_v41 }
 0x488   : > { %v4049_v47 = vpack.c.bf16 %v4197_v42, %v4196_v43  ;;  %v4053_v53 = vpack.c.bf16 %v4202_v44, %v4201_v46 }
 0x489   : > { %v4205_v54 = vpop.permute.xlu0 %4204 }
 0x48a   : > { %4050 = vmatprep.subr.bf16.mxu0 %v4049_v47  ;;  %v4207_v55 = vunpack.i.h.bf16 %v4205_v54  ;;  %v4206_v56 = vunpack.i.l.bf16 %v4205_v54 }
 0x48b   : > { %4052 = vmatpush3.bf16.msra.mxu0 %v4049_v47 }
 0x48c   : > { %4054 = vmatprep.subr.bf16.mxu0 %v4053_v53  ;;  %v4057_v58 = vpack.c.bf16 %v4207_v55, %v4206_v56 }
 0x48d   : > { %v4210_v63 = vpop.permute.xlu0 %4209 }
 0x48e   : > { %v4212_v4 = vunpack.i.h.bf16 %v4210_v63  ;;  %v4211_v5 = vunpack.i.l.bf16 %v4210_v63 }
 0x48f   : > { %4056 = vmatpush3.bf16.msra.mxu0 %v4053_v53 }
 0x490   : > { %4059 = vmatprep.subr.msk.bf16.mxu0 %vm4798_vm3, %v4057_v58  ;;  %v4063_v9 = vpack.c.bf16 %v4212_v4, %v4211_v5 }
 0x491   : > { %v957_v19 = vpop.permute.xlu0 %956 }
 0x495   : > { %v961_v22 = vpop.permute.xlu0 %960 }
 0x4c4   : > { %v828_v60 = vpop.xlane.xlu1 %827 }
 0x4c5   : > { %4305 = vrcp.f32 %v828_v60 }
 0x4c8   : > { %v825_v61 = vpop.xlane.xlu1 %824 }
 0x4c9   : > { %4307 = vrcp.f32 %v825_v61 }
 0x4cc   : > { %v834_v62 = vpop.xlane.xlu1 %833 }
 0x4cd   : > { %4309 = vrcp.f32 %v834_v62 }
 0x4cf   : > { %v4306_v1 = vpop.eup %4305 }
 0x4d0   : > { %v831_v0 = vpop.xlane.xlu1 %830  ;;  %v838_v7 = vmul.f32 %v4306_v1, %v4298_v29 }
 0x4d1   : > { %4311 = vrcp.f32 %v831_v0 }
 0x4d3   : > { %v4308_v2 = vpop.eup %4307 }
 0x4d4   : > { %v836_v6 = vmul.f32 %v4308_v2, %v4300_v31  ;;  %v959_v20 = vpop.permute.xlu1 %958 }
 0x4d6   : > { %3931 = vmatprep.mubr.msk.f32.mxu0 %vm585_vm1, %v836_v6 }
 0x4d7   : > { %3932 = vmatmul.mubr.msk.f32.vlgmr.msra.gmra.mrb[4].mxu0 %vm585_vm1, %v838_v7  ;;  %v4310_v11 = vpop.eup %4309 }
 0x4d8   : > { %4062 = vmatpush3.bf16.xpose.msk.msra.mxu0 %vm4798_vm3, %v4057_v58  ;;  %v842_v17 = vmul.f32 %v4310_v11, %v4302_v34  ;;  %v963_v23 = vpop.permute.xlu1 %962 }
 0x4d9   : > { %4065 = vmatprep.subr.msk.bf16.mxu0 %vm4798_vm3, %v4063_v9 }
 0x4db   : > { %v4312_v12 = vpop.eup %4311 }
 0x4dc   : > { %v840_v14 = vmul.f32 %v4312_v12, %v4304_v36 }
 0x4de   : > { %3934 = vmatprep.mubr.msk.f32.mxu0 %vm585_vm1, %v840_v14 }
 0x4df   : > { %3935 = vmatmul.mubr.msk.f32.gmra.mrb[6].mxu0 %vm585_vm1, %v842_v17 }
 0x4e0   : > { %4068 = vmatpush3.bf16.xpose.msk.msra.mxu0 %vm4798_vm3, %v4063_v9  ;;  %3945 = vmatprep.mubr.msk.f32.mxu0 %vm693_vm2, %v957_v19 }
 0x4e7   : > { %3946 = vmatmul.mubr.msk.f32.vlgmr.msra.gmra.mrb[8].mxu0 %vm693_vm2, %v959_v20 }
 0x4e8   : > { %3948 = vmatprep.mubr.msk.f32.mxu0 %vm693_vm2, %v961_v22 }
 0x4eb   : > { %3949 = vmatmul.mubr.msk.f32.gmra.mrb[10].mxu0 %vm693_vm2, %v963_v23 }
 0x5aa   : > { %v4890_v24 = vpop.f32.mrb[4].mxu0 }
 0x5ab   : > { %v4892_v25 = vpop.f32.mrb[5].mxu0 }
 0x5b2   : > { %v4894_v26 = vpop.f32.mrb[6].mxu0 }
 0x5b3   : > { %v4896_v27 = vpop.f32.mrb[7].mxu0 }
 0x5ba   : > { %v3947_v28 = vpop.f32.mrb[8].mxu0 }
 0x5bb   : > { %v1060_v29 = vadd.f32 %v3947_v28, %v4825_v51  ;;  %v1054_v30 = vpop.f32.mrb[9].mxu0 }
 0x5bc   : > { %v1055_v31 = vadd.f32 %v1054_v30, %v4830_v52 }
 0x5bd   : > { %v1076_v32 = vsel %vm585_vm1, %v1060_v29, -inf }
 0x5be   : > { %1077 = vmax.xlane.f32.xlu1 %v1076_v32  ;;  %v3950_v34 = vpop.f32.mrb[10].mxu0  ;;  %v1073_v35 = vsel %vm585_vm1, %v1055_v31, -inf }
 0x5bf   : > { %v1064_v36 = vpop.f32.mrb[11].mxu0  ;;  %1074 = vmax.xlane.f32.xlu0 %v1073_v35  ;;  %v1070_v40 = vadd.f32 %v3950_v34, %v4837_v57 }
 0x5c0   : > { %v1065_v39 = vadd.f32 %v1064_v36, %v4843_v59 }
 0x5c1   : > { %v1082_v42 = vsel %vm585_vm1, %v1070_v40, -inf }
 0x5c2   : > { %v1079_v41 = vsel %vm585_vm1, %v1065_v39, -inf }
 0x5c3   : > { %1080 = vmax.xlane.f32.xlu0 %v1079_v41 }
 0x5c7   : > { %1083 = vmax.xlane.f32.xlu0 %v1082_v42 }
 0x5cf   : > { %4214 = vrot.lane.b32.xlu1 %v4858_v15, %s4494_s28 }
 0x5d3   : > { %4224 = vrot.lane.b32.xlu1 %v4792_v38, %s4495_s7 }
 0x64b   : > { %v1078_v43 = vpop.xlane.xlu1 %1077 }
 0x64c   : > { %v1086_v44 = vsub.f32 %v1060_v29, %v1078_v43  ;;  %v1075_v46 = vpop.xlane.xlu0 %1074 }
 0x64d   : > { %v1085_v47 = vsub.f32 %v1055_v31, %v1075_v46 }
 0x64e   : > { %v1091_v53 = vmul.f32 1.442695, %v1086_v44 }
 0x64f   : > { %v1089_v54 = vmul.f32 1.442695, %v1085_v47  ;;  %v4215_v55 = vpop.permute.xlu1 %4214 }
 0x650   : > { %4313 = vpow2.f32 %v1091_v53  ;;  %v4217_v56 = vunpack.i.h.bf16 %v4215_v55  ;;  %v4216_v58 = vunpack.i.l.bf16 %v4215_v55  ;;  %v1081_v1 = vpop.xlane.xlu0 %1080 }
 0x651   : > { %4315 = vpow2.f32 %v1089_v54  ;;  %v1087_v5 = vsub.f32 %v1065_v39, %v1081_v1 }
 0x652   : > { %v4069_v60 = vpack.c.bf16 %v4217_v56, %v4216_v58 }
 0x653   : > { %v1093_v7 = vmul.f32 1.442695, %v1087_v5  ;;  %v4225_v17 = vpop.permute.xlu1 %4224 }
 0x654   : > { %4070 = vmatprep.subr.bf16.mxu1 %v4069_v60  ;;  %v1084_v2 = vpop.xlane.xlu0 %1083  ;;  %v4227_v23 = vunpack.i.h.bf16 %v4225_v17  ;;  %v4226_v28 = vunpack.i.l.bf16 %v4225_v17 }
 0x655   : > { %4072 = vmatpush3.bf16.msra.mxu1 %v4069_v60  ;;  %v1088_v4 = vsub.f32 %v1070_v40, %v1084_v2 }
 0x656   : > { %v4077_v32 = vpack.c.bf16 %v4227_v23, %v4226_v28 }
 0x657   : > { %v1095_v6 = vmul.f32 1.442695, %v1088_v4 }
 0x659   : > { %4317 = vpow2.f32 %v1095_v6 }
 0x65a   : > { %v4314_v61 = vpop.eup %4313  ;;  %4319 = vpow2.f32 %v1093_v7 }
 0x65b   : > { %v4316_v62 = vpop.eup %4315  ;;  %v1100_v63 = vsel %vm585_vm1, %v4314_v61, 0.0 }
 0x65c   : > { %1101 = vadd.xlane.f32.xlu0 %v1100_v63  ;;  %v1097_v0 = vsel %vm585_vm1, %v4316_v62, 0.0 }
 0x65d   : > { %1098 = vadd.xlane.f32.xlu1 %v1097_v0 }
 0x663   : > { %v4318_v9 = vpop.eup %4317 }
 0x664   : > { %v4320_v11 = vpop.eup %4319  ;;  %v1106_v12 = vsel %vm585_vm1, %v4318_v9, 0.0 }
 0x665   : > { %v1103_v14 = vsel %vm585_vm1, %v4320_v11, 0.0 }
 0x66e   : > { %4229 = vrot.lane.b32.xlu1 %v4788_v37, %s4495_s7 }
 0x672   : > { %4219 = vrot.lane.b32.xlu0 %v4860_v16, %s4494_s28 }
 0x691   : > { %1107 = vadd.xlane.f32.xlu0 %v1106_v12 }
 0x692   : > { %1104 = vadd.xlane.f32.xlu1 %v1103_v14 }
 0x6a3   : > { %1228 = vrot.lane.b32.xlu1 %v4810_v48, %s4496_s16 }
 0x6a7   : > { %1232 = vrot.lane.b32.xlu1 %v4818_v50, %s4496_s16  ;;  %1226 = vrot.lane.b32.xlu0 %v4785_v33, %s4496_s16 }
 0x6ab   : > { %1230 = vrot.lane.b32.xlu0 %v4812_v49, %s4496_s16 }
 0x6e9   : > { %v1102_v19 = vpop.xlane.xlu0 %1101 }
 0x6ea   : > { %4321 = vrcp.f32 %v1102_v19  ;;  %v1099_v20 = vpop.xlane.xlu1 %1098 }
 0x6eb   : > { %4323 = vrcp.f32 %v1099_v20 }
 0x6ed   : > { %v4220_v22 = vpop.permute.xlu0 %4219 }
 0x6ee   : > { %v4222_v29 = vunpack.i.h.bf16 %v4220_v22  ;;  %v4221_v30 = vunpack.i.l.bf16 %v4220_v22  ;;  %v4230_v35 = vpop.permute.xlu1 %4229 }
 0x6ef   : > { %v4232_v41 = vunpack.i.h.bf16 %v4230_v35  ;;  %v4231_v42 = vunpack.i.l.bf16 %v4230_v35 }
 0x6f0   : > { %v4073_v31 = vpack.c.bf16 %v4222_v29, %v4221_v30 }
 0x6f1   : > { %v4083_v43 = vpack.c.bf16 %v4232_v41, %v4231_v42 }
 0x6f2   : > { %4074 = vmatprep.subr.bf16.mxu1 %v4073_v31 }
 0x6f3   : > { %4076 = vmatpush3.bf16.msra.mxu1 %v4073_v31 }
 0x6f4   : > { %v4322_v34 = vpop.eup %4321  ;;  %4079 = vmatprep.subr.msk.bf16.mxu1 %vm4798_vm3, %v4077_v32 }
 0x6f5   : > { %v4324_v36 = vpop.eup %4323  ;;  %v1112_v40 = vmul.f32 %v4322_v34, %v4314_v61 }
 0x6f6   : > { %v1110_v39 = vmul.f32 %v4324_v36, %v4316_v62 }
 0x6f8   : > { %3959 = vmatprep.mubr.msk.f32.mxu1 %vm585_vm1, %v1110_v39 }
 0x6f9   : > { %3960 = vmatmul.mubr.msk.f32.vlgmr.msra.gmra.mrb[4].mxu1 %vm585_vm1, %v1112_v40 }
 0x6fc   : > { %4082 = vmatpush3.bf16.xpose.msk.msra.mxu1 %vm4798_vm3, %v4077_v32 }
 0x6fd   : > { %4085 = vmatprep.subr.msk.bf16.mxu1 %vm4798_vm3, %v4083_v43 }
 0x704   : > { %4088 = vmatpush3.bf16.xpose.msk.msra.mxu1 %vm4798_vm3, %v4083_v43 }
 0x71e   : > { %v1108_v44 = vpop.xlane.xlu0 %1107 }
 0x71f   : > { %4325 = vrcp.f32 %v1108_v44  ;;  %v1105_v46 = vpop.xlane.xlu1 %1104 }
 0x720   : > { %4327 = vrcp.f32 %v1105_v46 }
 0x722   : > { %v1227_v55 = vpop.permute.xlu0 %1226 }
 0x723   : > { %v1229_v58 = vpop.permute.xlu1 %1228 }
 0x726   : > { %v1231_v60 = vpop.permute.xlu0 %1230 }
 0x727   : > { %v1233_v61 = vpop.permute.xlu1 %1232 }
 0x729   : > { %v4326_v47 = vpop.eup %4325 }
 0x72a   : > { %v4328_v53 = vpop.eup %4327  ;;  %v1116_v56 = vmul.f32 %v4326_v47, %v4318_v9 }
 0x72b   : > { %v1114_v54 = vmul.f32 %v4328_v53, %v4320_v11 }
 0x72d   : > { %3962 = vmatprep.mubr.msk.f32.mxu1 %vm585_vm1, %v1114_v54 }
 0x72e   : > { %3963 = vmatmul.mubr.msk.f32.gmra.mrb[6].mxu1 %vm585_vm1, %v1116_v56 }
 0x72f   : > { %3973 = vmatprep.mubr.msk.f32.mxu1 %vm693_vm2, %v1227_v55 }
 0x732   : > { %3974 = vmatmul.mubr.msk.f32.vlgmr.msra.gmra.mrb[8].mxu1 %vm693_vm2, %v1229_v58 }
 0x733   : > { %3976 = vmatprep.mubr.msk.f32.mxu1 %vm693_vm2, %v1231_v60 }
 0x736   : > { %3977 = vmatmul.mubr.msk.f32.gmra.mrb[10].mxu1 %vm693_vm2, %v1233_v61 }
 0x7cc   : > { %v4934_v62 = vpop.f32.mrb[4].mxu1 }
 0x7cd   : > { %v4936_v63 = vpop.f32.mrb[5].mxu1 }
 0x7ce   : > { %v4263_v0 = vpack.i.bf16 %v4934_v62, %v4936_v63 }
 0x801   : > { %v4940_v1 = vpop.f32.mrb[6].mxu1 }
 0x802   : > { %v4942_v2 = vpop.f32.mrb[7].mxu1 }
 0x803   : > { %v4268_v4 = vpack.i.bf16 %v4940_v1, %v4942_v2 }
 0x805   : > { %v3975_v5 = vpop.f32.mrb[8].mxu1 }
 0x806   : > { %v1330_v6 = vadd.f32 %v3975_v5, %v4825_v51  ;;  %v1324_v7 = vpop.f32.mrb[9].mxu1 }
 0x807   : > { %v1325_v9 = vadd.f32 %v1324_v7, %v4830_v52 }
 0x808   : > { %v1346_v11 = vsel %vm585_vm1, %v1330_v6, -inf }
 0x809   : > { %1347 = vmax.xlane.f32.xlu1 %v1346_v11  ;;  %v3978_v12 = vpop.f32.mrb[10].mxu1  ;;  %v1343_v14 = vsel %vm585_vm1, %v1325_v9, -inf }
 0x80a   : > { %v1334_v17 = vpop.f32.mrb[11].mxu1  ;;  %1344 = vmax.xlane.f32.xlu0 %v1343_v14  ;;  %v1340_v20 = vadd.f32 %v3978_v12, %v4837_v57 }
 0x80b   : > { %v1335_v19 = vadd.f32 %v1334_v17, %v4843_v59 }
 0x80c   : > { %v1352_v23 = vsel %vm585_vm1, %v1340_v20, -inf }
 0x80d   : > { %v1349_v22 = vsel %vm585_vm1, %v1335_v19, -inf }
 0x80e   : > { %1350 = vmax.xlane.f32.xlu0 %v1349_v22 }
 0x812   : > { %1353 = vmax.xlane.f32.xlu0 %v1352_v23 }
 0x81a   : > { %4234 = vrot.lane.b32.xlu1 %v4858_v15, %s4497_s25 }
 0x81e   : > { %4244 = vrot.lane.b32.xlu1 %v4792_v38, %s4498_s22 }
 0x822   : > { %4249 = vrot.lane.b32.xlu1 %v4788_v37, %s4498_s22 }
 0x896   : > { %v1348_v28 = vpop.xlane.xlu1 %1347 }
 0x897   : > { %v1356_v29 = vsub.f32 %v1330_v6, %v1348_v28  ;;  %v1345_v30 = vpop.xlane.xlu0 %1344 }
 0x898   : > { %v1355_v31 = vsub.f32 %v1325_v9, %v1345_v30 }
 0x899   : > { %v1361_v32 = vmul.f32 1.442695, %v1356_v29 }
 0x89a   : > { %v1359_v34 = vmul.f32 1.442695, %v1355_v31  ;;  %v4235_v35 = vpop.permute.xlu1 %4234 }
 0x89b   : > { %4329 = vpow2.f32 %v1361_v32  ;;  %v4237_v36 = vunpack.i.h.bf16 %v4235_v35  ;;  %v4236_v39 = vunpack.i.l.bf16 %v4235_v35  ;;  %v1351_v43 = vpop.xlane.xlu0 %1350 }
 0x89c   : > { %4331 = vpow2.f32 %v1359_v34  ;;  %v1357_v47 = vsub.f32 %v1335_v19, %v1351_v43 }
 0x89d   : > { %v4089_v40 = vpack.c.bf16 %v4237_v36, %v4236_v39 }
 0x89e   : > { %v1363_v54 = vmul.f32 1.442695, %v1357_v47 }
 0x89f   : > { %4090 = vmatprep.subr.bf16.mxu0 %v4089_v40  ;;  %v1354_v44 = vpop.xlane.xlu0 %1353 }
 0x8a0   : > { %4092 = vmatpush3.bf16.msra.mxu0 %v4089_v40  ;;  %v1358_v46 = vsub.f32 %v1340_v20, %v1354_v44 }
 0x8a2   : > { %v1365_v53 = vmul.f32 1.442695, %v1358_v46 }
 0x8a4   : > { %4333 = vpow2.f32 %v1365_v53 }
 0x8a5   : > { %v4330_v41 = vpop.eup %4329  ;;  %4335 = vpow2.f32 %v1363_v54 }
 0x8a6   : > { %v4332_v42 = vpop.eup %4331  ;;  %v1370_v38 = vsel %vm585_vm1, %v4330_v41, 0.0 }
 0x8a7   : > { %1371 = vadd.xlane.f32.xlu0 %v1370_v38  ;;  %v1367_v37 = vsel %vm585_vm1, %v4332_v42, 0.0 }
 0x8a8   : > { %1368 = vadd.xlane.f32.xlu1 %v1367_v37 }
 0x8ae   : > { %v4334_v55 = vpop.eup %4333 }
 0x8af   : > { %v4336_v56 = vpop.eup %4335  ;;  %v1376_v58 = vsel %vm585_vm1, %v4334_v55, 0.0 }
 0x8b0   : > { %v1373_v60 = vsel %vm585_vm1, %v4336_v56, 0.0 }
 0x8b9   : > { %1498 = vrot.lane.b32.xlu1 %v4810_v48, %s4499_s12  ;;  %v4245_v48 = vpop.permute.xlu1 %4244 }
 0x8ba   : > { %v4247_v9 = vunpack.i.h.bf16 %v4245_v48  ;;  %v4246_v11 = vunpack.i.l.bf16 %v4245_v48 }
 0x8bc   : > { %v4097_v19 = vpack.c.bf16 %v4247_v9, %v4246_v11 }
 0x8bd   : > { %4239 = vrot.lane.b32.xlu0 %v4860_v16, %s4497_s25  ;;  %v4250_v61 = vpop.permute.xlu1 %4249 }
 0x8be   : > { %v4252_v20 = vunpack.i.h.bf16 %v4250_v61  ;;  %v4251_v22 = vunpack.i.l.bf16 %v4250_v61 }
 0x8c0   : > { %v4103_v28 = vpack.c.bf16 %v4252_v20, %v4251_v22 }
 0x8dc   : > { %1377 = vadd.xlane.f32.xlu0 %v1376_v58 }
 0x8dd   : > { %1374 = vadd.xlane.f32.xlu1 %v1373_v60 }
 0x8ee   : > { %1502 = vrot.lane.b32.xlu1 %v4818_v50, %s4499_s12 }
 0x8f2   : > { %1496 = vrot.lane.b32.xlu0 %v4785_v33, %s4499_s12 }
 0x8f6   : > { %1500 = vrot.lane.b32.xlu0 %v4812_v49, %s4499_s12 }
 0x934   : > { %v1372_v5 = vpop.xlane.xlu0 %1371 }
 0x935   : > { %4337 = vrcp.f32 %v1372_v5  ;;  %v1369_v6 = vpop.xlane.xlu1 %1368 }
 0x936   : > { %4339 = vrcp.f32 %v1369_v6 }
 0x938   : > { %v4240_v7 = vpop.permute.xlu0 %4239 }
 0x939   : > { %v4242_v12 = vunpack.i.h.bf16 %v4240_v7  ;;  %v4241_v14 = vunpack.i.l.bf16 %v4240_v7  ;;  %v1499_v29 = vpop.permute.xlu1 %1498 }
 0x93b   : > { %v4093_v17 = vpack.c.bf16 %v4242_v12, %v4241_v14 }
 0x93d   : > { %4094 = vmatprep.subr.bf16.mxu0 %v4093_v17 }
 0x93e   : > { %4096 = vmatpush3.bf16.msra.mxu0 %v4093_v17 }
 0x93f   : > { %v4338_v50 = vpop.eup %4337  ;;  %4099 = vmatprep.subr.msk.bf16.mxu0 %vm4798_vm3, %v4097_v19 }
 0x940   : > { %v4340_v33 = vpop.eup %4339  ;;  %v1382_v23 = vmul.f32 %v4338_v50, %v4330_v41 }
 0x941   : > { %v1380_v49 = vmul.f32 %v4340_v33, %v4332_v42 }
 0x943   : > { %3987 = vmatprep.mubr.msk.f32.mxu0 %vm585_vm1, %v1380_v49 }
 0x944   : > { %3988 = vmatmul.mubr.msk.f32.vlgmr.msra.gmra.mrb[12].mxu0 %vm585_vm1, %v1382_v23 }
 0x947   : > { %4102 = vmatpush3.bf16.xpose.msk.msra.mxu0 %vm4798_vm3, %v4097_v19 }
 0x948   : > { %4105 = vmatprep.subr.msk.bf16.mxu0 %vm4798_vm3, %v4103_v28 }
 0x94f   : > { %4108 = vmatpush3.bf16.xpose.msk.msra.mxu0 %vm4798_vm3, %v4103_v28 }
 0x969   : > { %v1378_v30 = vpop.xlane.xlu0 %1377 }
 0x96a   : > { %4341 = vrcp.f32 %v1378_v30  ;;  %v1375_v31 = vpop.xlane.xlu1 %1374 }
 0x96b   : > { %4343 = vrcp.f32 %v1375_v31 }
 0x96d   : > { %v1497_v36 = vpop.permute.xlu0 %1496 }
 0x96e   : > { %v1503_v45 = vpop.permute.xlu1 %1502 }
 0x971   : > { %v1501_v40 = vpop.permute.xlu0 %1500 }
 0x974   : > { %v4342_v32 = vpop.eup %4341 }
 0x975   : > { %v4344_v34 = vpop.eup %4343  ;;  %v1386_v39 = vmul.f32 %v4342_v32, %v4334_v55 }
 0x976   : > { %v1384_v35 = vmul.f32 %v4344_v34, %v4336_v56 }
 0x978   : > { %3990 = vmatprep.mubr.msk.f32.mxu0 %vm585_vm1, %v1384_v35 }
 0x979   : > { %3991 = vmatmul.mubr.msk.f32.gmra.mrb[14].mxu0 %vm585_vm1, %v1386_v39 }
 0x97a   : > { %4001 = vmatprep.mubr.msk.f32.mxu0 %vm693_vm2, %v1497_v36 }
 0x97d   : > { %4002 = vmatmul.mubr.msk.f32.vlgmr.msra.gmra.mrb[16].mxu0 %vm693_vm2, %v1499_v29 }
 0x97e   : > { %4004 = vmatprep.mubr.msk.f32.mxu0 %vm693_vm2, %v1501_v40 }
 0x981   : > { %4005 = vmatmul.mubr.msk.f32.gmra.mrb[18].mxu0 %vm693_vm2, %v1503_v45 }
 0xa17   : > { %v3989_v41 = vpop.f32.mrb[12].mxu0 }
 0xa18   : > { %v1477_v42 = vpop.f32.mrb[13].mxu0 }
 0xa19   : > { %v4273_v38 = vpack.i.bf16 %v3989_v41, %v1477_v42 }
 0xa4c   : > { %v3992_v37 = vpop.f32.mrb[14].mxu0 }
 0xa4d   : > { %v1487_v43 = vpop.f32.mrb[15].mxu0 }
 0xa4e   : > { %v4278_v44 = vpack.i.bf16 %v3992_v37, %v1487_v43 }
 0xa50   : > { %v4003_v46 = vpop.f32.mrb[16].mxu0 }
 0xa51   : > { %v1600_v47 = vadd.f32 %v4003_v46, %v4825_v51  ;;  %v1594_v53 = vpop.f32.mrb[17].mxu0 }
 0xa52   : > { %v1595_v54 = vadd.f32 %v1594_v53, %v4830_v52 }
 0xa53   : > { %v1616_v55 = vsel %vm585_vm1, %v1600_v47, -inf }
 0xa54   : > { %1617 = vmax.xlane.f32.xlu1 %v1616_v55  ;;  %v4006_v56 = vpop.f32.mrb[18].mxu0  ;;  %v1613_v58 = vsel %vm585_vm1, %v1595_v54, -inf }
 0xa55   : > { %v1604_v60 = vpop.f32.mrb[19].mxu0  ;;  %1614 = vmax.xlane.f32.xlu0 %v1613_v58  ;;  %v1610_v61 = vadd.f32 %v4006_v56, %v4837_v57 }
 0xa56   : > { %v1605_v48 = vadd.f32 %v1604_v60, %v4843_v59 }
 0xa57   : > { %v1622_v51 = vsel %vm585_vm1, %v1610_v61, -inf }
 0xa58   : > { %v1619_v5 = vsel %vm585_vm1, %v1605_v48, -inf }
 0xa59   : > { %1620 = vmax.xlane.f32.xlu0 %v1619_v5 }
 0xa5d   : > { %1623 = vmax.xlane.f32.xlu0 %v1622_v51 }
 0xae1   : > { %v1618_v6 = vpop.xlane.xlu1 %1617 }
 0xae2   : > { %v1626_v52 = vsub.f32 %v1600_v47, %v1618_v6  ;;  %v1615_v7 = vpop.xlane.xlu0 %1614 }
 0xae3   : > { %v1625_v9 = vsub.f32 %v1595_v54, %v1615_v7 }
 0xae4   : > { %v1631_v11 = vmul.f32 1.442695, %v1626_v52 }
 0xae5   : > { %v1629_v12 = vmul.f32 1.442695, %v1625_v9 }
 0xae6   : > { %4345 = vpow2.f32 %v1631_v11  ;;  %v1621_v14 = vpop.xlane.xlu0 %1620 }
 0xae7   : > { %4347 = vpow2.f32 %v1629_v12  ;;  %v1627_v17 = vsub.f32 %v1605_v48, %v1621_v14 }
 0xae9   : > { %v1633_v19 = vmul.f32 1.442695, %v1627_v17 }
 0xaea   : > { %v1624_v59 = vpop.xlane.xlu0 %1623 }
 0xaeb   : > { %4349 = vpow2.f32 %v1633_v19  ;;  %v1628_v57 = vsub.f32 %v1610_v61, %v1624_v59 }
 0xaed   : > { %v1635_v50 = vmul.f32 1.442695, %v1628_v57 }
 0xaef   : > { %4351 = vpow2.f32 %v1635_v50 }
 0xaf0   : > { %v4346_v33 = vpop.eup %4345 }
 0xaf1   : > { %v4348_v49 = vpop.eup %4347  ;;  %v1640_v20 = vsel %vm585_vm1, %v4346_v33, 0.0 }
 0xaf2   : > { %1641 = vadd.xlane.f32.xlu0 %v1640_v20  ;;  %v1637_v22 = vsel %vm585_vm1, %v4348_v49, 0.0 }
 0xaf3   : > { %1638 = vadd.xlane.f32.xlu1 %v1637_v22 }
 0xaf5   : > { %v4350_v23 = vpop.eup %4349 }
 0xaf6   : > { %v1643_v28 = vsel %vm585_vm1, %v4350_v23, 0.0 }
 0xaf7   : > { %1644 = vadd.xlane.f32.xlu1 %v1643_v28 }
 0xaf9   : > { %v4352_v29 = vpop.eup %4351 }
 0xafa   : > { %v1646_v30 = vsel %vm585_vm1, %v4352_v29, 0.0 }
 0xafb   : > { %1647 = vadd.xlane.f32.xlu0 %v1646_v30 }
 0xb08   : > { %4254 = vrot.lane.b32.xlu1 %v4858_v15, %s4500_s24 }
 0xb0c   : > { %1834 = vrot.lane.b32.xlu1 %v4748_v8, %s4489_s20 }
 0xb10   : > { %4264 = vrot.lane.b32.xlu1 %v4263_v0, %s4501_s23 }
 0xb11   : > { %4259 = vrot.lane.b32.xlu0 %v4860_v16, %s4500_s24 }
 0xb14   : > { %4274 = vrot.lane.b32.xlu1 %v4273_v38, %s4502_s21 }
 0xb15   : > { %4269 = vrot.lane.b32.xlu0 %v4268_v4, %s4501_s23 }
 0xb19   : > { %4279 = vrot.lane.b32.xlu0 %v4278_v44, %s4502_s21 }
 0xb1d   : > { %1836 = vrot.lane.b32.xlu0 %v4750_v10, %s4489_s20  ;;  %s4503_s20 = smov 24  }
 0xb7f   : > { %v1642_v8 = vpop.xlane.xlu0 %1641 }
 0xb80   : > { %v1639_v15 = vpop.xlane.xlu1 %1638 }
 0xb81   : > { %4353 = vrcp.f32 %v1639_v15  ;;  %v4504_v15 = vmov 0  }
 0xb82   : > { %4355 = vrcp.f32 %v1642_v8  ;;  %4293 = vset.pattern.permute.xlu1 %v4504_v15  ;;  %4294 = vset.pattern.permute.xlu0 %v4504_v15  ;;  %v5033_v8 = vsub.s32 3, %v4753_v13 }
 0xb83   : > { %2308 = vmatprep.mubr.bf16.mxu0 %v4504_v15 }
 0xb84   : > { %v1645_v31 = vpop.xlane.xlu1 %1644 }
 0xb85   : > { %4357 = vrcp.f32 %v1645_v31  ;;  %v5036_v31 = vld [vmem:[%s4722_s27] sm:$0xff] }
 0xb88   : > { %v4255_v62 = vpop.permute.xlu1 %4254  ;;  %v1648_v63 = vpop.xlane.xlu0 %1647 }
 0xb89   : > { %v4257_v0 = vunpack.i.h.bf16 %v4255_v62  ;;  %v4256_v16 = vunpack.i.l.bf16 %v4255_v62  ;;  %4359 = vrcp.f32 %v1648_v63  ;;  %v1833_v62 = vrot.slane %v5036_v31, %v5033_v8 }
 0xb8b   : > { %v4354_v32 = vpop.eup %4353  ;;  %v4109_v34 = vpack.c.bf16 %v4257_v0, %v4256_v16 }
 0xb8c   : > { %v4260_v35 = vpop.permute.xlu0 %4259  ;;  %v1650_v1 = vmul.f32 %v4354_v32, %v4348_v49  ;;  %v4356_v36 = vpop.eup %4355 }
 0xb8d   : > { %v4262_v2 = vunpack.i.h.bf16 %v4260_v35  ;;  %v4261_v4 = vunpack.i.l.bf16 %v4260_v35  ;;  %4110 = vmatprep.subr.bf16.mxu1 %v4109_v34  ;;  %v1835_v42 = vpop.permute.xlu1 %1834  ;;  %v1652_v38 = vmul.f32 %v4356_v36, %v4346_v33 }
 0xb8e   : > { %4112 = vmatpush3.bf16.msra.mxu1 %v4109_v34  ;;  %4015 = vmatprep.mubr.msk.f32.mxu1 %vm585_vm1, %v1650_v1 }
 0xb8f   : > { %v4113_v10 = vpack.c.bf16 %v4262_v2, %v4261_v4  ;;  %v4358_v40 = vpop.eup %4357  ;;  %v4378_v2 = vld [vmem:[#allocation2] sm:$0xff] }
 0xb90   : > { %v4270_v39 = vpop.permute.xlu0 %4269  ;;  %v1654_v46 = vmul.f32 %v4358_v40, %v4350_v23 }
 0xb91   : > { %v4272_v45 = vunpack.i.h.bf16 %v4270_v39  ;;  %v4271_v41 = vunpack.i.l.bf16 %v4270_v39  ;;  %4114 = vmatprep.subr.bf16.mxu1 %v4113_v10  ;;  %v4265_v48 = vpop.permute.xlu1 %4264  ;;  %v4379_v39 = vld [vmem:[#allocation2 + $0x8] sm:$0xff] }
 0xb92   : > { %4116 = vmatpush3.bf16.msra.mxu1 %v4113_v10  ;;  %v4267_v5 = vunpack.i.h.bf16 %v4265_v48  ;;  %v4266_v51 = vunpack.i.l.bf16 %v4265_v48 }
 0xb93   : > { %v1817_v37 = vsel %vm693_vm2, %v4894_v26, %v4272_v45  ;;  %v1816_v43 = vsel %vm693_vm2, %v4896_v27, %v4271_v41  ;;  %4021 = vmatprep.subr.bf16.mxu1 %v1835_v42  ;;  %v4360_v44 = vpop.eup %4359  ;;  %v4380_v45 = vld [vmem:[#allocation2 + $0x10] sm:$0xff] }
 0xb94   : > { %v1656_v47 = vmul.f32 %v4360_v44, %v4352_v29  ;;  %v4280_v53 = vpop.permute.xlu0 %4279  ;;  %v1815_v9 = vsel %vm693_vm2, %v4890_v24, %v4267_v5  ;;  %v1814_v11 = vsel %vm693_vm2, %v4892_v25, %v4266_v51 }
 0xb95   : > { %4016 = vmatmul.mubr.msk.f32.vlgmr.msra.gmra.mrb[12].mxu1 %vm585_vm1, %v1652_v38  ;;  %v4275_v61 = vpop.permute.xlu1 %4274  ;;  %v4282_v59 = vunpack.i.h.bf16 %v4280_v53  ;;  %v4281_v57 = vunpack.i.l.bf16 %v4280_v53 }
 0xb96   : > { %4018 = vmatprep.mubr.msk.f32.mxu1 %vm585_vm1, %v1654_v46  ;;  %4022 = vmatpush3.bf16.msra.mxu1 %v1835_v42  ;;  %v4277_v6 = vunpack.i.h.bf16 %v4275_v61  ;;  %v4276_v52 = vunpack.i.l.bf16 %v4275_v61  ;;  %v561_v46 = vld [vmem:[%s5518_s2] sm:$0xff] }
 0xb97   : > { %v1821_v23 = vsel %vm1818_vm4, %v1816_v43, %v4281_v57  ;;  %v1822_v25 = vsel %vm1818_vm4, %v1817_v37, %v4282_v59  ;;  %v4381_v37 = vld [vmem:[#allocation2 + $0x18] sm:$0xff]  ;;  %v562_v59 = vld [vmem:[%s5518_s2 + $0x8] sm:$0xff]  ;;  %v1994_v57 = vld [vmem:[%s4702_s29] sm:$0xff] }
 0xb98   : > { %v1837_v54 = vpop.permute.xlu0 %1836  ;;  %v1819_v17 = vsel %vm1818_vm4, %v1814_v11, %v4276_v52  ;;  %v1820_v19 = vsel %vm1818_vm4, %v1815_v9, %v4277_v6 }
 0xb99   : > { %4019 = vmatmul.mubr.msk.f32.gmra.mrb[14].mxu1 %vm585_vm1, %v1656_v47  ;;  %4023 = vmatprep.subr.bf16.mxu1 %v1837_v54 }
 0xb9a   : > { %4024 = vmatpush3.bf16.msra.mxu1 %v1837_v54 }
 0xc68   : > { %v4017_v55 = vpop.f32.mrb[12].mxu1 }
 0xc69   : > { %v1747_v26 = vpop.f32.mrb[13].mxu1 }
 0xc6a   : > { %v4283_v56 = vpack.i.bf16 %v4017_v55, %v1747_v26 }
 0xc6c   : > { %4284 = vrot.lane.b32.xlu1 %v4283_v56, %s4503_s20  ;;  %v4020_v27 = vpop.f32.mrb[14].mxu1 }
 0xc6d   : > { %v1757_v58 = vpop.f32.mrb[15].mxu1 }
 0xc6e   : > { %v4288_v60 = vpack.i.bf16 %v4020_v27, %v1757_v58 }
 0xc70   : > { %4289 = vrot.lane.b32.xlu1 %v4288_v60, %s4503_s20 }
 0xcde   : > { %v4285_v7 = vpop.permute.xlu1 %4284 }
 0xcdf   : > { %v4287_v12 = vunpack.i.h.bf16 %v4285_v7  ;;  %v4286_v14 = vunpack.i.l.bf16 %v4285_v7 }
 0xce1   : > { %v1825_v50 = vsel %vm1823_vm5, %v1820_v19, %v4287_v12  ;;  %v1824_v33 = vsel %vm1823_vm5, %v1819_v17, %v4286_v14  ;;  %v563_v17 = vld [vmem:[%s5518_s2 + $0x10] sm:$0xff]  ;;  %v564_v19 = vld [vmem:[%s5518_s2 + $0x18] sm:$0xff] }
 0xce2   : > { %v1828_v49 = vpack.c.bf16 %v1825_v50, %v1824_v33  ;;  %v4290_v20 = vpop.permute.xlu1 %4289  ;;  %v2002_v50 = vld [vmem:[%s4702_s29 + $0x40] sm:$0xff]  ;;  %v1995_v33 = vld [vmem:[%s4702_s29 + $0x8] sm:$0xff] }
 0xce3   : > { %v4292_v22 = vunpack.i.h.bf16 %v4290_v20  ;;  %v4291_v24 = vunpack.i.l.bf16 %v4290_v20  ;;  %v2003_v20 = vld [vmem:[%s4702_s29 + $0x48] sm:$0xff] }
 0xce4   : > { %4025 = vmatprep.mubr.msk.bf16.mxu1 %vm585_vm1, %v1828_v49  ;;  %v3722_v49 = vcombine.high %v1994_v57, %v2002_v50 }
 0xce5   : > { %v1827_v28 = vsel %vm1823_vm5, %v1822_v25, %v4292_v22  ;;  %v1826_v29 = vsel %vm1823_vm5, %v1821_v23, %v4291_v24  ;;  %v3721_v22 = vcombine.low %v1994_v57, %v2002_v50  ;;  %v3723_v24 = vcombine.low %v1995_v33, %v2003_v20  ;;  %v2010_v25 = vld [vmem:[%s4702_s29 + $0x80] sm:$0xff] }
 0xce6   : > { %v1829_v30 = vpack.c.bf16 %v1827_v28, %v1826_v29  ;;  %v3724_v23 = vcombine.high %v1995_v33, %v2003_v20  ;;  %2276 = vmatprep.subr.bf16.mxu0 %v3722_v49  ;;  %v2018_v28 = vld [vmem:[%s4702_s29 + $0xc0] sm:$0xff]  ;;  %v2011_v29 = vld [vmem:[%s4702_s29 + $0x88] sm:$0xff]  ;;  %v2013_v49 = vld [vmem:[%s4702_s29 + $0x98] sm:$0xff] }
 0xce7   : > { %2277 = vmatpush1.bf16.msra.mxu0 %v3721_v22  ;;  %v2021_v20 = vld [vmem:[%s4702_s29 + $0xd8] sm:$0xff] }
 0xce8   : > { %4026 = vmatmul.mubr.msk.bf16.vlgmr.msra.gmra.mrb[16].mxu1 %vm585_vm1, %v1829_v30  ;;  %2329 = vmatprep.subr.bf16.mxu1 %v3724_v23  ;;  %v3738_v30 = vcombine.high %v2010_v25, %v2018_v28  ;;  %v1998_v23 = vld [vmem:[%s4702_s29 + $0x20] sm:$0xff] }
 0xce9   : > { %2361 = vmatprep.mubr.bf16.mxu1 %v4504_v15  ;;  %2330 = vmatpush1.bf16.msra.mxu1 %v3723_v24 }
 0xcea   : > { %2278 = vmatprep.subr.bf16.mxu0 %v3738_v30  ;;  %v1999_v30 = vld [vmem:[%s4702_s29 + $0x28] sm:$0xff] }
 0xdbb   : > { %v4027_v63 = vpop.f32.mrb[16].mxu1 }
 0xdbc   : > { %v1880_v0 = vpop.f32.mrb[17].mxu1  ;;  %v1889_v16 = vadd.f32 %v4027_v63, %v1833_v62  ;;  %v3737_v63 = vcombine.low %v2010_v25, %v2018_v28  ;;  %v3744_v28 = vcombine.high %v2013_v49, %v2021_v20 }
 0xdbd   : > { %v1881_v32 = vadd.f32 %v1880_v0, %v1833_v62  ;;  %v4028_v34 = vpop.f32.mrb[18].mxu1 }
 0xdbe   : > { %v1883_v35 = vpop.f32.mrb[19].mxu1  ;;  %v1892_v10 = vadd.f32 %v4028_v34, %v1833_v62  ;;  %v1897_v41 = vadd.f32 %v4380_v45, %v1889_v16  ;;  %2279 = vmatpush1.bf16.msra.mxu0 %v3737_v63  ;;  %v5088_v34 = vld [vmem:[%s4702_s29 + $0x50] sm:$0xff] }
 0xdbf   : > { %v1884_v1 = vadd.f32 %v1883_v35, %v1833_v62  ;;  %v1895_v4 = vadd.f32 %v4378_v2, %v1881_v32  ;;  %v2019_v62 = vld [vmem:[%s4702_s29 + $0xc8] sm:$0xff]  ;;  %v5085_v32 = vld [vmem:[%s4702_s29 + $0x10] sm:$0xff]  ;;  %v1997_v2 = vld [vmem:[%s4702_s29 + $0x18] sm:$0xff] }
 0xdc0   : > { %v1905_v38 = vsel %vm585_vm1, %v1897_v41, 0.0  ;;  %v1898_v43 = vadd.f32 %v4381_v37, %v1892_v10  ;;  %v3739_v0 = vcombine.low %v2011_v29, %v2019_v62  ;;  %v3740_v16 = vcombine.high %v2011_v29, %v2019_v62  ;;  %v2006_v29 = vld [vmem:[%s4702_s29 + $0x60] sm:$0xff]  ;;  %v2007_v62 = vld [vmem:[%s4702_s29 + $0x68] sm:$0xff] }
 0xdc1   : > { %v1899_v36 = vsel %vm585_vm1, %v1895_v4, 0.0  ;;  %v1896_v40 = vadd.f32 %v4379_v39, %v1884_v1  ;;  %v3725_v35 = vcombine.low %v5085_v32, %v5088_v34  ;;  %v3726_v1 = vcombine.high %v5085_v32, %v5088_v34 }
 0xdc2   : > { %1900 = vadd.xlane.f32.xlu0 %v1899_v36  ;;  %v1908_v44 = vsel %vm585_vm1, %v1898_v43, 0.0  ;;  %2331 = vmatprep.subr.bf16.mxu1 %v3740_v16  ;;  %v3743_v32 = vcombine.low %v2013_v49, %v2021_v20 }
 0xdc3   : > { %v1902_v42 = vsel %vm585_vm1, %v1896_v40, 0.0  ;;  %2332 = vmatpush1.bf16.msra.mxu1 %v3739_v0  ;;  %2382 = vmatprep.subr.bf16.mxu0 %v3726_v1  ;;  %v3730_v1 = vcombine.high %v1998_v23, %v2006_v29 }
 0xdc4   : > { %1903 = vadd.xlane.f32.xlu1 %v1902_v42 }
 0xdc6   : > { %1906 = vadd.xlane.f32.xlu0 %v1905_v38 }
 0xdca   : > { %1909 = vadd.xlane.f32.xlu0 %v1908_v44 }
 0xdd5   : > { %1970 = vperm.xlu1 %4293, %v561_v46  }
 0xe4f   : > { %v1901_v47 = vpop.xlane.xlu0 %1900 }
 0xe50   : > { %v1912_v53 = vmul.f32 0.03125, %v1901_v47 }
 0xe51   : > { %v1904_v54 = vpop.xlane.xlu1 %1903 }
 0xe52   : > { %v5047_v56 = vsub.f32 %v1895_v4, %v1912_v53  ;;  %v1913_v27 = vmul.f32 0.03125, %v1904_v54  ;;  %v2005_v4 = vld [vmem:[%s4702_s29 + $0x58] sm:$0xff] }
 0xe53   : > { %v1907_v55 = vpop.xlane.xlu0 %1906  ;;  %v3727_v10 = vcombine.low %v1997_v2, %v2005_v4  ;;  %v3728_v36 = vcombine.high %v1997_v2, %v2005_v4  ;;  %v3732_v2 = vcombine.high %v1999_v30, %v2007_v62 }
 0xe54   : > { %v1914_v26 = vmul.f32 0.03125, %v1907_v55  ;;  %v5053_v5 = vsub.f32 %v1896_v40, %v1913_v27  ;;  %v1920_v52 = vmul.f32 %v5047_v56, %v5047_v56  ;;  %v5099_v55 = vsub.s32 5, %v4753_v13 }
 0xe55   : > { %2435 = vmatprep.subr.bf16.mxu1 %v3728_v36  ;;  %v5096_v39 = vpop.permute.xlu1 %1970  ;;  %v2022_v36 = vld [vmem:[%s4702_s29 + $0xe0] sm:$0xff] }
 0xe56   : > { %v5049_v58 = vsub.f32 %v1897_v41, %v1914_v26  ;;  %v1924_v9 = vsel %vm585_vm1, %v1920_v52, 0.0  ;;  %v1921_v12 = vmul.f32 %v5053_v5, %v5053_v5  ;;  %v1955_v27 = vrot.slane %v5036_v31, %v5099_v55 }
 0xe57   : > { %v1910_v60 = vpop.xlane.xlu0 %1909 }
 0xe58   : > { %v1915_v48 = vmul.f32 0.03125, %v1910_v60  ;;  %v1922_v61 = vmul.f32 %v5049_v58, %v5049_v58  ;;  %v1927_v14 = vsel %vm585_vm1, %v1921_v12, 0.0  ;;  %v5104_v60 = vsub.s32 6, %v4753_v13 }
 0xe5a   : > { %v5055_v51 = vsub.f32 %v1898_v43, %v1915_v48  ;;  %v1930_v6 = vsel %vm585_vm1, %v1922_v61, 0.0 }
 0xe5b   : > { %1931 = vadd.xlane.f32.xlu1 %v1930_v6 }
 0xe5c   : > { %v1923_v7 = vmul.f32 %v5055_v51, %v5055_v51 }
 0xe5e   : > { %v1933_v11 = vsel %vm585_vm1, %v1923_v7, 0.0 }
 0xe5f   : > { %1925 = vadd.xlane.f32.xlu1 %v1924_v9  ;;  %1934 = vadd.xlane.f32.xlu0 %v1933_v11  ;;  %v1963_v9 = vrot.slane %v5036_v31, %v5104_v60  ;;  %v2012_v31 = vld [vmem:[%s4702_s29 + $0x90] sm:$0xff] }
 0xe63   : > { %1928 = vadd.xlane.f32.xlu0 %v1927_v14 }
 0xe70   : > { %1980 = vperm.xlu1 %4293, %v563_v17  }
 0xe74   : > { %1985 = vperm.xlu1 %4293, %v564_v19  }
 0xe79   : > { %1975 = vperm.xlu0 %4294, %v562_v59  }
 0xee8   : > { %v1932_v40 = vpop.xlane.xlu1 %1931 }
 0xee9   : > { %v1938_v45 = vmul.f32 0.03125, %v1932_v40  ;;  %v2015_v40 = vld [vmem:[%s4702_s29 + $0xa8] sm:$0xff] }
 0xeeb   : > { %v1942_v46 = vadd.f32 1e-05, %v1938_v45  ;;  %v2023_v45 = vld [vmem:[%s4702_s29 + $0xe8] sm:$0xff] }
 0xeec   : > { %v1926_v41 = vpop.xlane.xlu1 %1925  ;;  %v1935_v42 = vpop.xlane.xlu0 %1934 }
 0xeed   : > { %v1936_v38 = vmul.f32 0.03125, %v1926_v41  ;;  %v1939_v37 = vmul.f32 0.03125, %v1935_v42  ;;  %v3729_v41 = vcombine.low %v1998_v23, %v2006_v29  ;;  %v3731_v42 = vcombine.low %v1999_v30, %v2007_v62  ;;  %v2820_v23 = vld [vmem:[%s4708_s11 + $0xc0] sm:$0xff]  ;;  %v5213_v62 = vld [vmem:[%s4708_s11 + $0x10] sm:$0xff] }
 0xeef   : > { %v1940_v43 = vadd.f32 1e-05, %v1936_v38  ;;  %v1943_v44 = vadd.f32 1e-05, %v1939_v37  ;;  %v2000_v38 = vld [vmem:[%s4702_s29 + $0x30] sm:$0xff] }
 0xef0   : > { %v1929_v47 = vpop.xlane.xlu0 %1928  ;;  %v5114_v50 = vpop.permute.xlu1 %1980 }
 0xef1   : > { %4361 = vrsqrt.f32 %v1940_v43  ;;  %v1937_v53 = vmul.f32 0.03125, %v1929_v47  ;;  %v3748_v43 = vcombine.high %v2015_v40, %v2023_v45  ;;  %v2009_v47 = vld [vmem:[%s4702_s29 + $0x78] sm:$0xff] }
 0xef2   : > { %4363 = vrsqrt.f32 %v1943_v44  ;;  %v2008_v44 = vld [vmem:[%s4702_s29 + $0x70] sm:$0xff] }
 0xef3   : > { %v1941_v54 = vadd.f32 1e-05, %v1937_v53  ;;  %4365 = vrsqrt.f32 %v1942_v46  ;;  %v2001_v46 = vld [vmem:[%s4702_s29 + $0x38] sm:$0xff] }
 0xef4   : > { %v5138_v0 = vpop.permute.xlu1 %1985 }
 0xef5   : > { %4367 = vrsqrt.f32 %v1941_v54  ;;  %v3747_v54 = vcombine.low %v2015_v40, %v2023_v45 }
 0xefb   : > { %v4362_v26 = vpop.eup %4361 }
 0xefc   : > { %v1948_v48 = vmul.f32 %v4362_v26, %v5047_v56  ;;  %v4364_v61 = vpop.eup %4363  ;;  %v5112_v56 = vpop.permute.xlu0 %1975  ;;  %v3734_v26 = vcombine.high %v2000_v38, %v2008_v44 }
 0xefd   : > { %v4366_v6 = vpop.eup %4365  ;;  %v1951_v11 = vmul.f32 %v4364_v61, %v5055_v51  ;;  %v2024_v61 = vld [vmem:[%s4702_s29 + $0xf0] sm:$0xff] }
 0xefe   : > { %v1956_v52 = vmul.f32 %v1955_v27, %v1948_v48  ;;  %v1950_v14 = vmul.f32 %v4366_v6, %v5049_v58  ;;  %v2020_v58 = vld [vmem:[%s4702_s29 + $0xd0] sm:$0xff]  ;;  %v2017_v6 = vld [vmem:[%s4702_s29 + $0xb8] sm:$0xff] }
 0xeff   : > { %v4368_v7 = vpop.eup %4367  ;;  %v1959_v59 = vmul.f32 %v1955_v27, %v1951_v11  ;;  %v3742_v25 = vcombine.high %v2012_v31, %v2020_v58  ;;  %v3741_v16 = vcombine.low %v2012_v31, %v2020_v58  ;;  %v2016_v48 = vld [vmem:[%s4702_s29 + $0xb0] sm:$0xff]  ;;  %v2796_v11 = vld [vmem:[%s4708_s11] sm:$0xff] }
 0xf00   : > { %v1949_v12 = vmul.f32 %v4368_v7, %v5053_v5  ;;  %v1964_v19 = vadd.f32 %v1963_v9, %v1956_v52  ;;  %v1958_v33 = vmul.f32 %v1955_v27, %v1950_v14  ;;  %v2025_v52 = vld [vmem:[%s4702_s29 + $0xf8] sm:$0xff]  ;;  %v3733_v7 = vcombine.low %v2000_v38, %v2008_v44 }
 0xf01   : > { %v1967_v22 = vadd.f32 %v1963_v9, %v1959_v59  ;;  %v3752_v14 = vcombine.high %v2017_v6, %v2025_v52  ;;  %v2805_v59 = vld [vmem:[%s4708_s11 + $0x48] sm:$0xff]  ;;  %v3751_v31 = vcombine.low %v2017_v6, %v2025_v52 }
 0xf02   : > { %v1957_v17 = vmul.f32 %v1955_v27, %v1949_v12  ;;  %v5118_v51 = vmul.f32 %v5096_v39, %v1964_v19  ;;  %v1966_v63 = vadd.f32 %v1963_v9, %v1958_v33  ;;  %v3736_v27 = vcombine.high %v2001_v46, %v2009_v47  ;;  %v2797_v19 = vld [vmem:[%s4708_s11 + $0x8] sm:$0xff] }
 0xf03   : > { %v5141_v34 = vmul.f32 %v5138_v0, %v1967_v22  ;;  %v3750_v12 = vcombine.high %v2016_v48, %v2024_v61  ;;  %v3772_v58 = vcombine.high %v2797_v19, %v2805_v59  ;;  %v3771_v20 = vcombine.low %v2797_v19, %v2805_v59  ;;  %v2812_v22 = vld [vmem:[%s4708_s11 + $0x80] sm:$0xff]  ;;  %v5247_v59 = vld [vmem:[%s4708_s11 + $0x90] sm:$0xff] }
 0xf04   : > { %v1965_v57 = vadd.f32 %v1963_v9, %v1957_v17  ;;  %v3735_v9 = vcombine.low %v2001_v46, %v2009_v47  ;;  %v2804_v17 = vld [vmem:[%s4708_s11 + $0x40] sm:$0xff]  ;;  %v3785_v29 = vcombine.low %v2812_v22, %v2820_v23 }
 0xf05   : > { %v3770_v33 = vcombine.high %v2796_v11, %v2804_v17  ;;  %v3769_v49 = vcombine.low %v2796_v11, %v2804_v17  ;;  %v5244_v11 = vsub.s32 4, %v4753_v13 }
 0xf06   : > { %v5121_v5 = vmul.f32 %v5112_v56, %v1965_v57  ;;  %v3749_v57 = vcombine.low %v2016_v48, %v2024_v61 }
 0xf08   : > { %v5128_v24 = vpack.c.bf16 %v5121_v5, %v5118_v51 }
 0xf0a   : > { %3753 = vmatmul.mubr.msk.bf16.vlgmr.msra.gmra.mrb[20].mxu0 %vm585_vm1, %v5128_v24  ;;  %3755 = vmatmul.mubr.msk.bf16.vlgmr.msra.gmra.mrb[20].mxu1 %vm585_vm1, %v5128_v24 }
 0xf0b   : > { %2383 = vmatpush1.bf16.msra.mxu0 %v3725_v35  ;;  %2436 = vmatpush1.bf16.msra.mxu1 %v3727_v10  ;;  %v5146_v35 = vmul.f32 %v5114_v50, %v1966_v63  ;;  %v2014_v10 = vld [vmem:[%s4702_s29 + $0xa0] sm:$0xff]  ;;  %v5216_v63 = vld [vmem:[%s4708_s11 + $0x50] sm:$0xff] }
 0xf0c   : > { %2318 = vmatprep.mubr.bf16.mxu0 %v4504_v15  ;;  %2371 = vmatprep.mubr.bf16.mxu1 %v4504_v15  ;;  %v3746_v37 = vcombine.high %v2014_v10, %v2022_v36  ;;  %v3745_v53 = vcombine.low %v2014_v10, %v2022_v36  ;;  %v5233_v36 = vld [vmem:[%s4727_s30] sm:$0xff] }
 0xf0d   : > { %2384 = vmatprep.subr.bf16.mxu0 %v3742_v25  ;;  %2437 = vmatprep.subr.bf16.mxu1 %v3744_v28  ;;  %v5150_v4 = vpack.c.bf16 %v5141_v34, %v5146_v35  ;;  %v2813_v25 = vld [vmem:[%s4708_s11 + $0x88] sm:$0xff]  ;;  %v2033_v40 = vrot.slane %v5233_v36, %v4770_v21  ;;  %v2041_v45 = vrot.slane %v5233_v36, %v4851_v3 }
 0xf0e   : > { %v2821_v28 = vld [vmem:[%s4708_s11 + $0xc8] sm:$0xff] }
 0xf0f   : > { %2385 = vmatpush1.bf16.msra.mxu0 %v3741_v16  ;;  %2438 = vmatpush1.bf16.msra.mxu1 %v3743_v32  ;;  %v3787_v30 = vcombine.low %v2813_v25, %v2821_v28  ;;  %v5219_v16 = vld [vmem:[%s4708_s11 + $0x18] sm:$0xff]  ;;  %v3774_v32 = vcombine.high %v5213_v62, %v5216_v63 }
 0xf10   : > { %2488 = vmatprep.subr.bf16.mxu0 %v3730_v1  ;;  %2541 = vmatprep.subr.bf16.mxu1 %v3732_v2  ;;  %v5224_v1 = vld [vmem:[%s4708_s11 + $0x58] sm:$0xff]  ;;  %v3773_v2 = vcombine.low %v5213_v62, %v5216_v63  ;;  %v5291_v62 = vld [vmem:[%s4708_s11 + $0x60] sm:$0xff] }
 0xf11   : > { %v3776_v10 = vcombine.high %v5219_v16, %v5224_v1 }
 0xf12   : > { %3754 = vmatmul.mubr.msk.bf16.gmra.mrb[24].mxu0 %vm585_vm1, %v5150_v4  ;;  %3756 = vmatmul.mubr.msk.bf16.gmra.mrb[24].mxu1 %vm585_vm1, %v5150_v4 }
 0xf13   : > { %2414 = vmatprep.mubr.bf16.mxu0 %v4504_v15  ;;  %2467 = vmatprep.mubr.bf16.mxu1 %v4504_v15 }
 0xf1a   : > { %3757 = vmatmul.mubr.msk.bf16.vlgmr.msra.gmra.mrb[28].mxu0 %vm585_vm1, %v5128_v24  ;;  %3759 = vmatmul.mubr.msk.bf16.vlgmr.msra.gmra.mrb[28].mxu1 %vm585_vm1, %v5128_v24 }
 0xf1b   : > { %2489 = vmatpush1.bf16.msra.mxu0 %v3729_v41  ;;  %2542 = vmatpush1.bf16.msra.mxu1 %v3731_v42  ;;  %v2037_v41 = vrot.slane %v5233_v36, %v4761_v18  ;;  %v2045_v42 = vrot.slane %v5233_v36, %v5033_v8 }
 0xf1c   : > { %2424 = vmatprep.mubr.bf16.mxu0 %v4504_v15  ;;  %2477 = vmatprep.mubr.bf16.mxu1 %v4504_v15 }
 0xf1d   : > { %2490 = vmatprep.subr.bf16.mxu0 %v3746_v37  ;;  %2543 = vmatprep.subr.bf16.mxu1 %v3748_v43 }
 0xf1f   : > { %2491 = vmatpush1.bf16.msra.mxu0 %v3745_v53  ;;  %2544 = vmatpush1.bf16.msra.mxu1 %v3747_v54 }
 0xf20   : > { %2594 = vmatprep.subr.bf16.mxu0 %v3734_v26  ;;  %2647 = vmatprep.subr.bf16.mxu1 %v3736_v27 }
 0xf22   : > { %3758 = vmatmul.mubr.msk.bf16.gmra.mrb[32].mxu0 %vm585_vm1, %v5150_v4  ;;  %3760 = vmatmul.mubr.msk.bf16.gmra.mrb[32].mxu1 %vm585_vm1, %v5150_v4 }
 0xf23   : > { %2520 = vmatprep.mubr.bf16.mxu0 %v4504_v15  ;;  %2573 = vmatprep.mubr.bf16.mxu1 %v4504_v15 }
 0xf2a   : > { %3761 = vmatmul.mubr.msk.bf16.vlgmr.msra.gmra.mrb[36].mxu0 %vm585_vm1, %v5128_v24  ;;  %3763 = vmatmul.mubr.msk.bf16.vlgmr.msra.gmra.mrb[36].mxu1 %vm585_vm1, %v5128_v24 }
 0xf2b   : > { %2595 = vmatpush1.bf16.msra.mxu0 %v3733_v7  ;;  %2648 = vmatpush1.bf16.msra.mxu1 %v3735_v9 }
 0xf2c   : > { %2530 = vmatprep.mubr.bf16.mxu0 %v4504_v15  ;;  %2583 = vmatprep.mubr.bf16.mxu1 %v4504_v15 }
 0xf2d   : > { %2596 = vmatprep.subr.bf16.mxu0 %v3750_v12  ;;  %2649 = vmatprep.subr.bf16.mxu1 %v3752_v14 }
 0xf2f   : > { %2597 = vmatpush1.bf16.msra.mxu0 %v3749_v57  ;;  %2650 = vmatpush1.bf16.msra.mxu1 %v3751_v31  ;;  %v5250_v57 = vld [vmem:[%s4708_s11 + $0xd0] sm:$0xff] }
 0xf30   : > { %2992 = vmatprep.subr.bf16.mxu0 %v3770_v33  ;;  %3041 = vmatprep.subr.bf16.mxu1 %v3772_v58 }
 0xf32   : > { %3762 = vmatmul.mubr.msk.bf16.gmra.mrb[40].mxu0 %vm585_vm1, %v5150_v4  ;;  %3764 = vmatmul.mubr.msk.bf16.gmra.mrb[40].mxu1 %vm585_vm1, %v5150_v4 }
 0xf33   : > { %2626 = vmatprep.mubr.bf16.mxu0 %v4504_v15  ;;  %2679 = vmatprep.mubr.bf16.mxu1 %v4504_v15 }
 0xf3a   : > { %3765 = vmatmul.mubr.msk.bf16.vlgmr.msra.gmra.mrb[44].mxu0 %vm585_vm1, %v5128_v24  ;;  %3767 = vmatmul.mubr.msk.bf16.vlgmr.msra.gmra.mrb[44].mxu1 %vm585_vm1, %v5128_v24  ;;  %v3786_v24 = vcombine.high %v2812_v22, %v2820_v23  ;;  %v5256_v22 = vld [vmem:[%s4708_s11 + $0xd8] sm:$0xff] }
 0xf3b   : > { %2636 = vmatprep.mubr.bf16.mxu0 %v4504_v15  ;;  %2689 = vmatprep.mubr.bf16.mxu1 %v4504_v15  ;;  %v3788_v15 = vcombine.high %v2813_v25, %v2821_v28 }
 0xf3c   : > { %2993 = vmatpush1.bf16.xpose.msra.mxu0 %v3769_v49  ;;  %3042 = vmatpush1.bf16.xpose.msra.mxu1 %v3771_v20  ;;  %v5253_v20 = vld [vmem:[%s4708_s11 + $0x98] sm:$0xff] }
 0xf3d   : > { %2994 = vmatprep.subr.bf16.mxu0 %v3786_v24  ;;  %3043 = vmatprep.subr.bf16.mxu1 %v3788_v15  ;;  %v5260_v15 = vrot.slane %v5233_v36, %v5244_v11 }
 0xf42   : > { %3766 = vmatmul.mubr.msk.bf16.gmra.mrb[48].mxu0 %vm585_vm1, %v5150_v4  ;;  %3768 = vmatmul.mubr.msk.bf16.gmra.mrb[48].mxu1 %vm585_vm1, %v5150_v4  ;;  %v3775_v4 = vcombine.low %v5219_v16, %v5224_v1  ;;  %v5294_v1 = vld [vmem:[%s4708_s11 + $0x28] sm:$0xff] }
 0xf44   : > { %2995 = vmatpush1.bf16.xpose.msra.mxu0 %v3785_v29  ;;  %3044 = vmatpush1.bf16.xpose.msra.mxu1 %v3787_v30 }
 0xf45   : > { %3090 = vmatprep.subr.bf16.mxu0 %v3774_v32  ;;  %3139 = vmatprep.subr.bf16.mxu1 %v3776_v10  ;;  %v5263_v32 = vsub.s32 7, %v4753_v13  ;;  %v5271_v13 = vrot.slane %v5233_v36, %v5104_v60 }
 0xfdd   : > { %v2310_v38 = vpop.f32.mrb[20].mxu0  ;;  %v2363_v37 = vpop.f32.mrb[20].mxu1 }
 0xfde   : > { %v2311_v43 = vadd.f32 %v2310_v38, %v2033_v40  ;;  %v2364_v44 = vadd.f32 %v2363_v37, %v2041_v45  ;;  %v2312_v46 = vpop.f32.mrb[21].mxu0  ;;  %v2365_v47 = vpop.f32.mrb[21].mxu1 }
 0xfdf   : > { %v2313_v53 = vadd.f32 %v2312_v46, %v2037_v41  ;;  %v2366_v54 = vadd.f32 %v2365_v47, %v2045_v42  ;;  %v2314_v26 = vpop.f32.mrb[22].mxu0  ;;  %v2367_v27 = vpop.f32.mrb[22].mxu1  ;;  %v3792_v46 = vcombine.high %v5253_v20, %v5256_v22 }
 0xfe0   : > { %v2315_v48 = vadd.f32 %v2314_v26, %v2033_v40  ;;  %v2368_v61 = vadd.f32 %v2367_v27, %v2041_v45  ;;  %v2316_v6 = vpop.f32.mrb[23].mxu0  ;;  %v2369_v52 = vpop.f32.mrb[23].mxu1  ;;  %v2700_v12 = vmax.f32 %v2311_v43, 0.0  ;;  %v2702_v14 = vmax.f32 %v2364_v44, 0.0 }
 0xfe1   : > { %v2317_v7 = vadd.f32 %v2316_v6, %v2037_v41  ;;  %v2370_v9 = vadd.f32 %v2369_v52, %v2045_v42  ;;  %v2701_v31 = vmax.f32 %v2313_v53, 0.0  ;;  %v2703_v33 = vmax.f32 %v2366_v54, 0.0 }
 0xfe2   : > { %v2716_v17 = vmax.f32 %v2315_v48, 0.0  ;;  %v2718_v19 = vmax.f32 %v2368_v61, 0.0  ;;  %v3790_v44 = vcombine.high %v5247_v59, %v5250_v57  ;;  %v5275_v52 = vrot.slane %v5233_v36, %v5099_v55 }
 0xfe3   : > { %v2717_v58 = vmax.f32 %v2317_v7, 0.0  ;;  %v2719_v49 = vmax.f32 %v2370_v9, 0.0 }
 0xfe4   : > { %v2764_v23 = vpack.c.bf16 %v2716_v17, %v2700_v12  ;;  %v2766_v25 = vpack.c.bf16 %v2718_v19, %v2702_v14 }
 0xfe5   : > { %v2765_v24 = vpack.c.bf16 %v2717_v58, %v2701_v31  ;;  %v2767_v28 = vpack.c.bf16 %v2719_v49, %v2703_v33  ;;  %v2320_v29 = vpop.f32.mrb[24].mxu0  ;;  %v2373_v30 = vpop.f32.mrb[24].mxu1 }
 0xfe6   : > { %v2321_v10 = vadd.f32 %v2320_v29, %v2033_v40  ;;  %v2374_v38 = vadd.f32 %v2373_v30, %v2041_v45  ;;  %v2322_v37 = vpop.f32.mrb[25].mxu0  ;;  %v2375_v43 = vpop.f32.mrb[25].mxu1 }
 0xfe7   : > { %v2323_v47 = vadd.f32 %v2322_v37, %v2037_v41  ;;  %v2376_v53 = vadd.f32 %v2375_v43, %v2045_v42  ;;  %v2324_v54 = vpop.f32.mrb[26].mxu0  ;;  %v2377_v26 = vpop.f32.mrb[26].mxu1  ;;  %3024 = vmatprep.mubr.bf16.mxu0 %v2765_v24  ;;  %3073 = vmatprep.mubr.bf16.mxu1 %v2767_v28 }
 0xfe8   : > { %v2325_v27 = vadd.f32 %v2324_v54, %v2033_v40  ;;  %v2378_v48 = vadd.f32 %v2377_v26, %v2041_v45  ;;  %v2326_v61 = vpop.f32.mrb[27].mxu0  ;;  %v2379_v6 = vpop.f32.mrb[27].mxu1  ;;  %3025 = vmatmul.mubr.bf16.vlgmr.msra.gmra.mrb[52].mxu0 %v2764_v23  ;;  %3074 = vmatmul.mubr.bf16.vlgmr.msra.gmra.mrb[52].mxu1 %v2766_v25  ;;  %v5285_v40 = vrot.slane %v5233_v36, %v5263_v32  ;;  %v2732_v45 = vmax.f32 %v2321_v10, 0.0  ;;  %v5316_v54 = vld [vmem:[%s4727_s30 + $0x8] sm:$0xff] }
 0xfe9   : > { %v2327_v7 = vadd.f32 %v2326_v61, %v2037_v41  ;;  %v2380_v9 = vadd.f32 %v2379_v6, %v2045_v42  ;;  %3091 = vmatpush1.bf16.xpose.msra.mxu0 %v3773_v2  ;;  %3140 = vmatpush1.bf16.xpose.msra.mxu1 %v3775_v4  ;;  %v2734_v12 = vmax.f32 %v2374_v38, 0.0  ;;  %v5288_v41 = vld [vmem:[%s4708_s11 + $0x20] sm:$0xff]  ;;  %v2733_v63 = vmax.f32 %v2323_v47, 0.0  ;;  %v5297_v4 = vld [vmem:[%s4708_s11 + $0x68] sm:$0xff] }
 0xfea   : > { %v2748_v14 = vmax.f32 %v2325_v27, 0.0  ;;  %v2750_v17 = vmax.f32 %v2378_v48, 0.0  ;;  %3092 = vmatprep.subr.bf16.mxu0 %v3790_v44  ;;  %3141 = vmatprep.subr.bf16.mxu1 %v3792_v46  ;;  %v2735_v2 = vmax.f32 %v2376_v53, 0.0  ;;  %v3789_v23 = vcombine.low %v5247_v59, %v5250_v57  ;;  %v5319_v6 = vld [vmem:[%s4708_s11 + $0xa0] sm:$0xff] }
 0xfeb   : > { %v2749_v42 = vmax.f32 %v2327_v7, 0.0  ;;  %v2751_v16 = vmax.f32 %v2380_v9, 0.0  ;;  %v3791_v25 = vcombine.low %v5253_v20, %v5256_v22  ;;  %v3778_v10 = vcombine.high %v5288_v41, %v5291_v62  ;;  %v5322_v7 = vld [vmem:[%s4708_s11 + $0xe0] sm:$0xff] }
 0xfec   : > { %v2780_v36 = vpack.c.bf16 %v2748_v14, %v2732_v45  ;;  %v2782_v19 = vpack.c.bf16 %v2750_v17, %v2734_v12  ;;  %v3780_v38 = vcombine.high %v5294_v1, %v5297_v4  ;;  %v5325_v17 = vld [vmem:[%s4708_s11 + $0xa8] sm:$0xff] }
 0xfed   : > { %v2781_v31 = vpack.c.bf16 %v2749_v42, %v2733_v63  ;;  %v2783_v33 = vpack.c.bf16 %v2751_v16, %v2735_v2  ;;  %v2416_v58 = vpop.f32.mrb[28].mxu0  ;;  %v2469_v49 = vpop.f32.mrb[28].mxu1  ;;  %v5328_v63 = vld [vmem:[%s4708_s11 + $0xe8] sm:$0xff]  ;;  %v3777_v16 = vcombine.low %v5288_v41, %v5291_v62  ;;  %v3794_v41 = vcombine.high %v5319_v6, %v5322_v7 }
 0xfee   : > { %v2417_v24 = vadd.f32 %v2416_v58, %v5260_v15  ;;  %v2470_v28 = vadd.f32 %v2469_v49, %v5271_v13  ;;  %v2418_v29 = vpop.f32.mrb[29].mxu0  ;;  %v2471_v30 = vpop.f32.mrb[29].mxu1  ;;  %v3779_v58 = vcombine.low %v5294_v1, %v5297_v4  ;;  %v5336_v49 = vrot.slane %v5316_v54, %v4770_v21 }
 0xfef   : > { %v2419_v37 = vadd.f32 %v2418_v29, %v5275_v52  ;;  %v2472_v59 = vadd.f32 %v2471_v30, %v5285_v40  ;;  %v2420_v57 = vpop.f32.mrb[30].mxu0  ;;  %v2473_v43 = vpop.f32.mrb[30].mxu1  ;;  %3032 = vmatprep.mubr.bf16.mxu0 %v2781_v31  ;;  %3081 = vmatprep.mubr.bf16.mxu1 %v2783_v33  ;;  %v3796_v62 = vcombine.high %v5325_v17, %v5328_v63 }
 0xff0   : > { %v2421_v20 = vadd.f32 %v2420_v57, %v5260_v15  ;;  %v2474_v22 = vadd.f32 %v2473_v43, %v5271_v13  ;;  %v2422_v44 = vpop.f32.mrb[31].mxu0  ;;  %v2475_v46 = vpop.f32.mrb[31].mxu1  ;;  %3033 = vmatmul.mubr.bf16.gmra.mrb[56].mxu0 %v2780_v36  ;;  %3082 = vmatmul.mubr.bf16.gmra.mrb[56].mxu1 %v2782_v19  ;;  %v2704_v26 = vmax.f32 %v2417_v24, 0.0  ;;  %v2706_v27 = vmax.f32 %v2470_v28, 0.0 }
 0xff1   : > { %v2423_v47 = vadd.f32 %v2422_v44, %v5275_v52  ;;  %v2476_v53 = vadd.f32 %v2475_v46, %v5285_v40  ;;  %3093 = vmatpush1.bf16.xpose.msra.mxu0 %v3789_v23  ;;  %3142 = vmatpush1.bf16.xpose.msra.mxu1 %v3791_v25  ;;  %v2705_v9 = vmax.f32 %v2419_v37, 0.0  ;;  %v2707_v45 = vmax.f32 %v2472_v59, 0.0  ;;  %v5366_v46 = vld [vmem:[%s4708_s11 + $0x70] sm:$0xff] }
 0xff2   : > { %v2720_v48 = vmax.f32 %v2421_v20, 0.0  ;;  %v2722_v61 = vmax.f32 %v2474_v22, 0.0  ;;  %3188 = vmatprep.subr.bf16.mxu0 %v3778_v10  ;;  %3237 = vmatprep.subr.bf16.mxu1 %v3780_v38  ;;  %v5348_v21 = vrot.slane %v5316_v54, %v4851_v3  ;;  %v5354_v57 = vrot.slane %v5316_v54, %v4761_v18  ;;  %v5363_v18 = vld [vmem:[%s4708_s11 + $0x30] sm:$0xff] }
 0xff3   : > { %v2721_v12 = vmax.f32 %v2423_v47, 0.0  ;;  %v2723_v14 = vmax.f32 %v2476_v53, 0.0  ;;  %v5360_v3 = vrot.slane %v5316_v54, %v5033_v8 }
 0xff4   : > { %v2768_v2 = vpack.c.bf16 %v2720_v48, %v2704_v26  ;;  %v2770_v42 = vpack.c.bf16 %v2722_v61, %v2706_v27  ;;  %v5369_v26 = vld [vmem:[%s4708_s11 + $0x38] sm:$0xff] }
 0xff5   : > { %v2769_v36 = vpack.c.bf16 %v2721_v12, %v2705_v9  ;;  %v2771_v19 = vpack.c.bf16 %v2723_v14, %v2707_v45  ;;  %v2426_v31 = vpop.f32.mrb[32].mxu0  ;;  %v2479_v33 = vpop.f32.mrb[32].mxu1  ;;  %v5372_v27 = vld [vmem:[%s4708_s11 + $0x78] sm:$0xff]  ;;  %v3793_v14 = vcombine.low %v5319_v6, %v5322_v7 }
 0xff6   : > { %v2427_v23 = vadd.f32 %v2426_v31, %v5260_v15  ;;  %v2480_v25 = vadd.f32 %v2479_v33, %v5271_v13  ;;  %v2428_v24 = vpop.f32.mrb[33].mxu0  ;;  %v2481_v28 = vpop.f32.mrb[33].mxu1  ;;  %v3782_v31 = vcombine.high %v5363_v18, %v5366_v46  ;;  %v3784_v33 = vcombine.high %v5369_v26, %v5372_v27 }
 0xff7   : > { %v2429_v29 = vadd.f32 %v2428_v24, %v5275_v52  ;;  %v2482_v1 = vadd.f32 %v2481_v28, %v5285_v40  ;;  %v2430_v4 = vpop.f32.mrb[34].mxu0  ;;  %v2483_v30 = vpop.f32.mrb[34].mxu1  ;;  %3122 = vmatprep.mubr.bf16.mxu0 %v2769_v36  ;;  %3171 = vmatprep.mubr.bf16.mxu1 %v2771_v19 }
 0xff8   : > { %v2431_v10 = vadd.f32 %v2430_v4, %v5260_v15  ;;  %v2484_v38 = vadd.f32 %v2483_v30, %v5271_v13  ;;  %v2432_v37 = vpop.f32.mrb[35].mxu0  ;;  %v2485_v59 = vpop.f32.mrb[35].mxu1  ;;  %3123 = vmatmul.mubr.bf16.vlgmr.msra.gmra.mrb[60].mxu0 %v2768_v2  ;;  %3172 = vmatmul.mubr.bf16.vlgmr.msra.gmra.mrb[60].mxu1 %v2770_v42  ;;  %v2736_v15 = vmax.f32 %v2427_v23, 0.0  ;;  %v2738_v13 = vmax.f32 %v2480_v25, 0.0  ;;  %v5391_v30 = vld [vmem:[%s4708_s11 + $0xb0] sm:$0xff] }
 0xff9   : > { %v2433_v43 = vadd.f32 %v2432_v37, %v5275_v52  ;;  %v2486_v20 = vadd.f32 %v2485_v59, %v5285_v40  ;;  %3189 = vmatpush1.bf16.xpose.msra.mxu0 %v3777_v16  ;;  %3238 = vmatpush1.bf16.xpose.msra.mxu1 %v3779_v58  ;;  %v2737_v52 = vmax.f32 %v2429_v29, 0.0  ;;  %v2739_v40 = vmax.f32 %v2482_v1, 0.0 }
 0xffa   : > { %v2752_v22 = vmax.f32 %v2431_v10, 0.0  ;;  %v2754_v44 = vmax.f32 %v2484_v38, 0.0  ;;  %3190 = vmatprep.subr.bf16.mxu0 %v3794_v41  ;;  %3239 = vmatprep.subr.bf16.mxu1 %v3796_v62  ;;  %v3795_v2 = vcombine.low %v5325_v17, %v5328_v63  ;;  %v5394_v10 = vld [vmem:[%s4708_s11 + $0xf0] sm:$0xff] }
 0xffb   : > { %v2753_v47 = vmax.f32 %v2433_v43, 0.0  ;;  %v2755_v53 = vmax.f32 %v2486_v20, 0.0  ;;  %v5397_v20 = vld [vmem:[%s4708_s11 + $0xb8] sm:$0xff] }
 0xffc   : > { %v2784_v8 = vpack.c.bf16 %v2752_v22, %v2736_v15  ;;  %v2786_v48 = vpack.c.bf16 %v2754_v44, %v2738_v13  ;;  %v5400_v15 = vld [vmem:[%s4708_s11 + $0xf8] sm:$0xff]  ;;  %v3781_v44 = vcombine.low %v5363_v18, %v5366_v46  ;;  %v3798_v18 = vcombine.high %v5391_v30, %v5394_v10 }
 0xffd   : > { %v2785_v61 = vpack.c.bf16 %v2753_v47, %v2737_v52  ;;  %v2787_v9 = vpack.c.bf16 %v2755_v53, %v2739_v40  ;;  %v2522_v45 = vpop.f32.mrb[36].mxu0  ;;  %v2575_v12 = vpop.f32.mrb[36].mxu1  ;;  %v3800_v46 = vcombine.high %v5397_v20, %v5400_v15 }
 0xffe   : > { %v2523_v42 = vadd.f32 %v2522_v45, %v5336_v49  ;;  %v2576_v16 = vadd.f32 %v2575_v12, %v5348_v21  ;;  %v2524_v36 = vpop.f32.mrb[37].mxu0  ;;  %v2577_v19 = vpop.f32.mrb[37].mxu1 }
 0xfff   : > { %v2525_v58 = vadd.f32 %v2524_v36, %v5354_v57  ;;  %v2578_v23 = vadd.f32 %v2577_v19, %v5360_v3  ;;  %v2526_v6 = vpop.f32.mrb[38].mxu0  ;;  %v2579_v7 = vpop.f32.mrb[38].mxu1  ;;  %3130 = vmatprep.mubr.bf16.mxu0 %v2785_v61  ;;  %3179 = vmatprep.mubr.bf16.mxu1 %v2787_v9 }
0x1000   : > { %v2527_v17 = vadd.f32 %v2526_v6, %v5336_v49  ;;  %v2580_v63 = vadd.f32 %v2579_v7, %v5348_v21  ;;  %v2528_v25 = vpop.f32.mrb[39].mxu0  ;;  %v2581_v24 = vpop.f32.mrb[39].mxu1  ;;  %3131 = vmatmul.mubr.bf16.gmra.mrb[64].mxu0 %v2784_v8  ;;  %3180 = vmatmul.mubr.bf16.gmra.mrb[64].mxu1 %v2786_v48  ;;  %v2708_v62 = vmax.f32 %v2523_v42, 0.0  ;;  %v2710_v29 = vmax.f32 %v2576_v16, 0.0 }
0x1001   : > { %v2529_v28 = vadd.f32 %v2528_v25, %v5354_v57  ;;  %v2582_v41 = vadd.f32 %v2581_v24, %v5360_v3  ;;  %3191 = vmatpush1.bf16.xpose.msra.mxu0 %v3793_v14  ;;  %3240 = vmatpush1.bf16.xpose.msra.mxu1 %v3795_v2  ;;  %v2709_v38 = vmax.f32 %v2525_v58, 0.0  ;;  %v2711_v37 = vmax.f32 %v2578_v23, 0.0 }
0x1002   : > { %v2724_v1 = vmax.f32 %v2527_v17, 0.0  ;;  %v2726_v4 = vmax.f32 %v2580_v63, 0.0  ;;  %3286 = vmatprep.subr.bf16.mxu0 %v3782_v31  ;;  %3335 = vmatprep.subr.bf16.mxu1 %v3784_v33  ;;  %v3783_v8 = vcombine.low %v5369_v26, %v5372_v27  ;;  %v5408_v48 = vrot.slane %v5316_v54, %v5244_v11 }
0x1003   : > { %v2725_v59 = vmax.f32 %v2529_v28, 0.0  ;;  %v2727_v43 = vmax.f32 %v2582_v41, 0.0  ;;  %v5420_v42 = vrot.slane %v5316_v54, %v5104_v60  ;;  %v5426_v33 = vrot.slane %v5316_v54, %v5099_v55 }
0x1004   : > { %v2772_v13 = vpack.c.bf16 %v2724_v1, %v2708_v62  ;;  %v2774_v22 = vpack.c.bf16 %v2726_v4, %v2710_v29  ;;  %v5432_v60 = vrot.slane %v5316_v54, %v5263_v32  ;;  %v3797_v54 = vcombine.low %v5391_v30, %v5394_v10 }
0x1005   : > { %v2773_v52 = vpack.c.bf16 %v2725_v59, %v2709_v38  ;;  %v2775_v40 = vpack.c.bf16 %v2727_v43, %v2711_v37  ;;  %v2532_v47 = vpop.f32.mrb[40].mxu0  ;;  %v2585_v53 = vpop.f32.mrb[40].mxu1  ;;  %v3799_v29 = vcombine.low %v5397_v20, %v5400_v15 }
0x1006   : > { %v2533_v61 = vadd.f32 %v2532_v47, %v5336_v49  ;;  %v2586_v9 = vadd.f32 %v2585_v53, %v5348_v21  ;;  %v2534_v45 = vpop.f32.mrb[41].mxu0  ;;  %v2587_v12 = vpop.f32.mrb[41].mxu1 }
0x1007   : > { %v2535_v14 = vadd.f32 %v2534_v45, %v5354_v57  ;;  %v2588_v26 = vadd.f32 %v2587_v12, %v5360_v3  ;;  %v2536_v27 = vpop.f32.mrb[42].mxu0  ;;  %v2589_v2 = vpop.f32.mrb[42].mxu1  ;;  %3220 = vmatprep.mubr.bf16.mxu0 %v2773_v52  ;;  %3269 = vmatprep.mubr.bf16.mxu1 %v2775_v40 }
0x1008   : > { %v2537_v16 = vadd.f32 %v2536_v27, %v5336_v49  ;;  %v2590_v36 = vadd.f32 %v2589_v2, %v5348_v21  ;;  %v2538_v19 = vpop.f32.mrb[43].mxu0  ;;  %v2591_v31 = vpop.f32.mrb[43].mxu1  ;;  %3221 = vmatmul.mubr.bf16.vlgmr.msra.gmra.mrb[68].mxu0 %v2772_v13  ;;  %3270 = vmatmul.mubr.bf16.vlgmr.msra.gmra.mrb[68].mxu1 %v2774_v22  ;;  %v2740_v49 = vmax.f32 %v2533_v61, 0.0  ;;  %v2742_v21 = vmax.f32 %v2586_v9, 0.0 }
0x1009   : > { %v2539_v58 = vadd.f32 %v2538_v19, %v5354_v57  ;;  %v2592_v23 = vadd.f32 %v2591_v31, %v5360_v3  ;;  %3287 = vmatpush1.bf16.xpose.msra.mxu0 %v3781_v44  ;;  %3336 = vmatpush1.bf16.xpose.msra.mxu1 %v3783_v8  ;;  %v2741_v17 = vmax.f32 %v2535_v14, 0.0  ;;  %v2743_v63 = vmax.f32 %v2588_v26, 0.0 }
0x100a   : > { %v2756_v6 = vmax.f32 %v2537_v16, 0.0  ;;  %v2758_v7 = vmax.f32 %v2590_v36, 0.0  ;;  %3288 = vmatprep.subr.bf16.mxu0 %v3798_v18  ;;  %3337 = vmatprep.subr.bf16.mxu1 %v3800_v46 }
0x100b   : > { %v2757_v55 = vmax.f32 %v2539_v58, 0.0  ;;  %v2759_v25 = vmax.f32 %v2592_v23, 0.0 }
0x100c   : > { %v2788_v24 = vpack.c.bf16 %v2756_v6, %v2740_v49  ;;  %v2790_v57 = vpack.c.bf16 %v2758_v7, %v2742_v21 }
0x100d   : > { %v2789_v28 = vpack.c.bf16 %v2757_v55, %v2741_v17  ;;  %v2791_v3 = vpack.c.bf16 %v2759_v25, %v2743_v63  ;;  %v2628_v41 = vpop.f32.mrb[44].mxu0  ;;  %v2681_v62 = vpop.f32.mrb[44].mxu1 }
0x100e   : > { %v2629_v1 = vadd.f32 %v2628_v41, %v5408_v48  ;;  %v2682_v4 = vadd.f32 %v2681_v62, %v5420_v42  ;;  %v2630_v38 = vpop.f32.mrb[45].mxu0  ;;  %v2683_v37 = vpop.f32.mrb[45].mxu1 }
0x100f   : > { %v2631_v59 = vadd.f32 %v2630_v38, %v5426_v33  ;;  %v2684_v43 = vadd.f32 %v2683_v37, %v5432_v60  ;;  %v2632_v13 = vpop.f32.mrb[46].mxu0  ;;  %v2685_v22 = vpop.f32.mrb[46].mxu1  ;;  %3228 = vmatprep.mubr.bf16.mxu0 %v2789_v28  ;;  %3277 = vmatprep.mubr.bf16.mxu1 %v2791_v3 }
0x1010   : > { %v2633_v44 = vadd.f32 %v2632_v13, %v5408_v48  ;;  %v2686_v30 = vadd.f32 %v2685_v22, %v5420_v42  ;;  %v2634_v10 = vpop.f32.mrb[47].mxu0  ;;  %v2687_v20 = vpop.f32.mrb[47].mxu1  ;;  %3229 = vmatmul.mubr.bf16.gmra.mrb[72].mxu0 %v2788_v24  ;;  %3278 = vmatmul.mubr.bf16.gmra.mrb[72].mxu1 %v2790_v57  ;;  %v2712_v40 = vmax.f32 %v2629_v1, 0.0  ;;  %v2714_v47 = vmax.f32 %v2682_v4, 0.0 }
0x1011   : > { %v2635_v15 = vadd.f32 %v2634_v10, %v5426_v33  ;;  %v2688_v52 = vadd.f32 %v2687_v20, %v5432_v60  ;;  %3289 = vmatpush1.bf16.xpose.msra.mxu0 %v3797_v54  ;;  %3338 = vmatpush1.bf16.xpose.msra.mxu1 %v3799_v29  ;;  %v2713_v61 = vmax.f32 %v2631_v59, 0.0  ;;  %v2715_v9 = vmax.f32 %v2684_v43, 0.0 }
0x1012   : > { %v2728_v53 = vmax.f32 %v2633_v44, 0.0  ;;  %v2730_v8 = vmax.f32 %v2686_v30, 0.0 }
0x1013   : > { %v2729_v45 = vmax.f32 %v2635_v15, 0.0  ;;  %v2731_v12 = vmax.f32 %v2688_v52, 0.0 }
0x1014   : > { %v2776_v18 = vpack.c.bf16 %v2728_v53, %v2712_v40  ;;  %v2778_v46 = vpack.c.bf16 %v2730_v8, %v2714_v47 }
0x1015   : > { %v2777_v14 = vpack.c.bf16 %v2729_v45, %v2713_v61  ;;  %v2779_v26 = vpack.c.bf16 %v2731_v12, %v2715_v9  ;;  %v2638_v27 = vpop.f32.mrb[48].mxu0  ;;  %v2691_v2 = vpop.f32.mrb[48].mxu1 }
0x1016   : > { %v2639_v16 = vadd.f32 %v2638_v27, %v5408_v48  ;;  %v2692_v36 = vadd.f32 %v2691_v2, %v5420_v42  ;;  %v2640_v19 = vpop.f32.mrb[49].mxu0  ;;  %v2693_v31 = vpop.f32.mrb[49].mxu1 }
0x1017   : > { %v2641_v58 = vadd.f32 %v2640_v19, %v5426_v33  ;;  %v2694_v23 = vadd.f32 %v2693_v31, %v5432_v60  ;;  %v2642_v49 = vpop.f32.mrb[50].mxu0  ;;  %v2695_v21 = vpop.f32.mrb[50].mxu1  ;;  %3318 = vmatprep.mubr.bf16.mxu0 %v2777_v14  ;;  %3367 = vmatprep.mubr.bf16.mxu1 %v2779_v26 }
0x1018   : > { %v2643_v6 = vadd.f32 %v2642_v49, %v5408_v48  ;;  %v2696_v7 = vadd.f32 %v2695_v21, %v5420_v42  ;;  %v2644_v17 = vpop.f32.mrb[51].mxu0  ;;  %v2697_v63 = vpop.f32.mrb[51].mxu1  ;;  %3319 = vmatmul.mubr.bf16.vlgmr.msra.gmra.mrb[76].mxu0 %v2776_v18  ;;  %3368 = vmatmul.mubr.bf16.vlgmr.msra.gmra.mrb[76].mxu1 %v2778_v46  ;;  %v2744_v24 = vmax.f32 %v2639_v16, 0.0  ;;  %v2746_v57 = vmax.f32 %v2692_v36, 0.0 }
0x1019   : > { %v2645_v55 = vadd.f32 %v2644_v17, %v5426_v33  ;;  %v2698_v25 = vadd.f32 %v2697_v63, %v5432_v60  ;;  %v2745_v41 = vmax.f32 %v2641_v58, 0.0  ;;  %v2747_v62 = vmax.f32 %v2694_v23, 0.0  ;;  %v5455_v33 = vld [vmem:[%s4722_s27] sm:$0xff] }
0x101a   : > { %v2760_v28 = vmax.f32 %v2643_v6, 0.0  ;;  %v2762_v3 = vmax.f32 %v2696_v7, 0.0  ;;  %v2831_v60 = vrot.slane %v5455_v33, %v5244_v11 }
0x101b   : > { %v2761_v54 = vmax.f32 %v2645_v55, 0.0  ;;  %v2763_v29 = vmax.f32 %v2698_v25, 0.0 }
0x101c   : > { %v2792_v48 = vpack.c.bf16 %v2760_v28, %v2744_v24  ;;  %v2794_v1 = vpack.c.bf16 %v2762_v3, %v2746_v57 }
0x101d   : > { %v2793_v42 = vpack.c.bf16 %v2761_v54, %v2745_v41  ;;  %v2795_v4 = vpack.c.bf16 %v2763_v29, %v2747_v62 }
0x101f   : > { %3326 = vmatprep.mubr.bf16.mxu0 %v2793_v42  ;;  %3375 = vmatprep.mubr.bf16.mxu1 %v2795_v4 }
0x1020   : > { %3327 = vmatmul.mubr.bf16.gmra.mrb[80].mxu0 %v2792_v48  ;;  %3376 = vmatmul.mubr.bf16.gmra.mrb[80].mxu1 %v2794_v1 }
0x10bb   : > { %v3026_v38 = vpop.f32.mrb[52].mxu0  ;;  %v3075_v37 = vpop.f32.mrb[52].mxu1 }
0x10bc   : > { %v3027_v59 = vadd.f32 %v3026_v38, %v2831_v60  ;;  %v3028_v43 = vpop.f32.mrb[53].mxu0  ;;  %v3077_v13 = vpop.f32.mrb[53].mxu1 }
0x10bd   : > { %v3029_v22 = vpop.f32.mrb[54].mxu0  ;;  %v3078_v44 = vpop.f32.mrb[54].mxu1 }
0x10be   : > { %v3076_v30 = vadd.f32 %v3075_v37, %v3027_v59  ;;  %v3030_v10 = vadd.f32 %v3029_v22, %v2831_v60  ;;  %v3031_v20 = vpop.f32.mrb[55].mxu0  ;;  %v3080_v15 = vpop.f32.mrb[55].mxu1 }
0x10c0   : > { %v3079_v52 = vadd.f32 %v3078_v44, %v3030_v10 }
0x10c3   : > { %v3034_v40 = vpop.f32.mrb[56].mxu0  ;;  %v3083_v47 = vpop.f32.mrb[56].mxu1 }
0x10c4   : > { %v3035_v53 = vadd.f32 %v3034_v40, %v2831_v60  ;;  %v3036_v8 = vpop.f32.mrb[57].mxu0  ;;  %v3085_v61 = vpop.f32.mrb[57].mxu1 }
0x10c5   : > { %v3037_v9 = vpop.f32.mrb[58].mxu0  ;;  %v3086_v45 = vpop.f32.mrb[58].mxu1 }
0x10c6   : > { %v3084_v11 = vadd.f32 %v3083_v47, %v3035_v53  ;;  %v3038_v12 = vadd.f32 %v3037_v9, %v2831_v60  ;;  %v3039_v18 = vpop.f32.mrb[59].mxu0  ;;  %v3088_v46 = vpop.f32.mrb[59].mxu1 }
0x10c8   : > { %v3087_v14 = vadd.f32 %v3086_v45, %v3038_v12 }
0x10cb   : > { %v3124_v26 = vpop.f32.mrb[60].mxu0  ;;  %v3173_v27 = vpop.f32.mrb[60].mxu1 }
0x10cc   : > { %v3125_v2 = vadd.f32 %v3124_v26, %v3076_v30  ;;  %v3126_v16 = vpop.f32.mrb[61].mxu0  ;;  %v3175_v36 = vpop.f32.mrb[61].mxu1 }
0x10cd   : > { %v3127_v19 = vpop.f32.mrb[62].mxu0  ;;  %v3176_v31 = vpop.f32.mrb[62].mxu1 }
0x10ce   : > { %v3174_v58 = vadd.f32 %v3173_v27, %v3125_v2  ;;  %v3128_v23 = vadd.f32 %v3127_v19, %v3079_v52  ;;  %v3129_v49 = vpop.f32.mrb[63].mxu0  ;;  %v3178_v21 = vpop.f32.mrb[63].mxu1 }
0x10d0   : > { %v3177_v6 = vadd.f32 %v3176_v31, %v3128_v23 }
0x10d3   : > { %v3132_v7 = vpop.f32.mrb[64].mxu0  ;;  %v3181_v17 = vpop.f32.mrb[64].mxu1 }
0x10d4   : > { %v3133_v63 = vadd.f32 %v3132_v7, %v3084_v11  ;;  %v3134_v55 = vpop.f32.mrb[65].mxu0  ;;  %v3183_v25 = vpop.f32.mrb[65].mxu1 }
0x10d5   : > { %v3135_v24 = vpop.f32.mrb[66].mxu0  ;;  %v3184_v57 = vpop.f32.mrb[66].mxu1 }
0x10d6   : > { %v3182_v28 = vadd.f32 %v3181_v17, %v3133_v63  ;;  %v3136_v3 = vadd.f32 %v3135_v24, %v3087_v14  ;;  %v3137_v41 = vpop.f32.mrb[67].mxu0  ;;  %v3186_v62 = vpop.f32.mrb[67].mxu1 }
0x10d8   : > { %v3185_v54 = vadd.f32 %v3184_v57, %v3136_v3 }
0x10db   : > { %v3222_v29 = vpop.f32.mrb[68].mxu0  ;;  %v3271_v48 = vpop.f32.mrb[68].mxu1 }
0x10dc   : > { %v3223_v1 = vadd.f32 %v3222_v29, %v3174_v58  ;;  %v3224_v42 = vpop.f32.mrb[69].mxu0  ;;  %v3273_v4 = vpop.f32.mrb[69].mxu1 }
0x10dd   : > { %v3225_v60 = vpop.f32.mrb[70].mxu0  ;;  %v3274_v38 = vpop.f32.mrb[70].mxu1 }
0x10de   : > { %v3272_v37 = vadd.f32 %v3271_v48, %v3223_v1  ;;  %v3226_v59 = vadd.f32 %v3225_v60, %v3177_v6  ;;  %v3227_v43 = vpop.f32.mrb[71].mxu0  ;;  %v3276_v13 = vpop.f32.mrb[71].mxu1 }
0x10e0   : > { %v3275_v22 = vadd.f32 %v3274_v38, %v3226_v59 }
0x10e3   : > { %v3230_v44 = vpop.f32.mrb[72].mxu0  ;;  %v3279_v30 = vpop.f32.mrb[72].mxu1 }
0x10e4   : > { %v3231_v10 = vadd.f32 %v3230_v44, %v3182_v28  ;;  %v3232_v20 = vpop.f32.mrb[73].mxu0  ;;  %v3281_v15 = vpop.f32.mrb[73].mxu1 }
0x10e5   : > { %v3233_v52 = vpop.f32.mrb[74].mxu0  ;;  %v3282_v40 = vpop.f32.mrb[74].mxu1 }
0x10e6   : > { %v3280_v47 = vadd.f32 %v3279_v30, %v3231_v10  ;;  %v3234_v53 = vadd.f32 %v3233_v52, %v3185_v54  ;;  %v3235_v8 = vpop.f32.mrb[75].mxu0  ;;  %v3284_v61 = vpop.f32.mrb[75].mxu1 }
0x10e8   : > { %v3283_v9 = vadd.f32 %v3282_v40, %v3234_v53 }
0x10eb   : > { %v3320_v45 = vpop.f32.mrb[76].mxu0  ;;  %v3369_v11 = vpop.f32.mrb[76].mxu1 }
0x10ec   : > { %v3321_v12 = vadd.f32 %v3320_v45, %v3272_v37  ;;  %v3322_v18 = vpop.f32.mrb[77].mxu0  ;;  %v3371_v46 = vpop.f32.mrb[77].mxu1 }
0x10ed   : > { %v3323_v14 = vpop.f32.mrb[78].mxu0  ;;  %v3372_v26 = vpop.f32.mrb[78].mxu1 }
0x10ee   : > { %v3370_v27 = vadd.f32 %v3369_v11, %v3321_v12  ;;  %v3324_v2 = vadd.f32 %v3323_v14, %v3275_v22  ;;  %v3325_v16 = vpop.f32.mrb[79].mxu0  ;;  %v3374_v36 = vpop.f32.mrb[79].mxu1  ;;  %v3443_v14 = vrot.slane %v5455_v33, %v5263_v32 }
0x10ef   : > { %v3801_v16 = vld [vmem:[%s4722_s27 + $0x8] ss:$0 sm:$0xff] }
0x10f0   : > { %v3373_v19 = vadd.f32 %v3372_v26, %v3324_v2  ;;  %v3384_v31 = vadd.f32 %v3370_v27, %v5118_v51 }
0x10f2   : > { %v3388_v58 = vsel %vm585_vm1, %v3384_v31, 0.0  ;;  %v3385_v23 = vadd.f32 %v3373_v19, %v5121_v5 }
0x10f3   : > { %v3328_v49 = vpop.f32.mrb[80].mxu0  ;;  %v3377_v21 = vpop.f32.mrb[80].mxu1  ;;  %3389 = vadd.xlane.f32.xlu1 %v3388_v58 }
0x10f4   : > { %v3329_v6 = vadd.f32 %v3328_v49, %v3280_v47  ;;  %v3330_v7 = vpop.f32.mrb[81].mxu0  ;;  %v3379_v17 = vpop.f32.mrb[81].mxu1  ;;  %v3391_v63 = vsel %vm585_vm1, %v3385_v23, 0.0 }
0x10f5   : > { %v3331_v55 = vpop.f32.mrb[82].mxu0  ;;  %v3380_v25 = vpop.f32.mrb[82].mxu1  ;;  %3392 = vadd.xlane.f32.xlu0 %v3391_v63 }
0x10f6   : > { %v3378_v24 = vadd.f32 %v3377_v21, %v3329_v6  ;;  %v3332_v57 = vadd.f32 %v3331_v55, %v3283_v9  ;;  %v3333_v28 = vpop.f32.mrb[83].mxu0  ;;  %v3382_v3 = vpop.f32.mrb[83].mxu1 }
0x10f8   : > { %v3381_v51 = vadd.f32 %v3380_v25, %v3332_v57  ;;  %v3386_v41 = vadd.f32 %v3378_v24, %v5146_v35 }
0x10fa   : > { %v3394_v5 = vsel %vm585_vm1, %v3386_v41, 0.0  ;;  %v3387_v62 = vadd.f32 %v3381_v51, %v5141_v34 }
0x10fb   : > { %3395 = vadd.xlane.f32.xlu1 %v3394_v5 }
0x10fc   : > { %v3397_v54 = vsel %vm585_vm1, %v3387_v62, 0.0 }
0x10ff   : > { %3398 = vadd.xlane.f32.xlu1 %v3397_v54 }
0x1180   : > { %v3390_v29 = vpop.xlane.xlu1 %3389 }
0x1181   : > { %v3400_v48 = vmul.f32 0.03125, %v3390_v29 }
0x1182   : > { %v3393_v1 = vpop.xlane.xlu0 %3392 }
0x1183   : > { %v3404_v42 = vsub.f32 %v3384_v31, %v3400_v48  ;;  %v3401_v4 = vmul.f32 0.03125, %v3393_v1 }
0x1185   : > { %v3405_v60 = vsub.f32 %v3385_v23, %v3401_v4  ;;  %v3408_v38 = vmul.f32 %v3404_v42, %v3404_v42 }
0x1187   : > { %v3412_v37 = vsel %vm585_vm1, %v3408_v38, 0.0  ;;  %v3409_v59 = vmul.f32 %v3405_v60, %v3405_v60 }
0x1188   : > { %3413 = vadd.xlane.f32.xlu1 %v3412_v37  ;;  %v3396_v35 = vpop.xlane.xlu1 %3395 }
0x1189   : > { %v3402_v43 = vmul.f32 0.03125, %v3396_v35  ;;  %v3415_v34 = vsel %vm585_vm1, %v3409_v59, 0.0 }
0x118b   : > { %v3406_v13 = vsub.f32 %v3386_v41, %v3402_v43 }
0x118c   : > { %3416 = vadd.xlane.f32.xlu1 %v3415_v34  ;;  %v3399_v22 = vpop.xlane.xlu1 %3398 }
0x118d   : > { %v3403_v44 = vmul.f32 0.03125, %v3399_v22  ;;  %v3410_v30 = vmul.f32 %v3406_v13, %v3406_v13 }
0x118f   : > { %v3407_v10 = vsub.f32 %v3387_v62, %v3403_v44  ;;  %v3418_v20 = vsel %vm585_vm1, %v3410_v30, 0.0 }
0x1190   : > { %3419 = vadd.xlane.f32.xlu1 %v3418_v20 }
0x1191   : > { %v3411_v15 = vmul.f32 %v3407_v10, %v3407_v10 }
0x1193   : > { %v3421_v52 = vsel %vm585_vm1, %v3411_v15, 0.0 }
0x1194   : > { %3422 = vadd.xlane.f32.xlu0 %v3421_v52 }
0x1215   : > { %v3414_v40 = vpop.xlane.xlu1 %3413 }
0x1216   : > { %v3424_v47 = vmul.f32 0.03125, %v3414_v40 }
0x1218   : > { %v3428_v53 = vadd.f32 1e-05, %v3424_v47 }
0x1219   : > { %v3417_v8 = vpop.xlane.xlu1 %3416 }
0x121a   : > { %4369 = vrsqrt.f32 %v3428_v53  ;;  %v3425_v61 = vmul.f32 0.03125, %v3417_v8 }
0x121c   : > { %v3429_v9 = vadd.f32 1e-05, %v3425_v61 }
0x121d   : > { %v3420_v45 = vpop.xlane.xlu1 %3419 }
0x121e   : > { %4371 = vrsqrt.f32 %v3429_v9  ;;  %v3426_v11 = vmul.f32 0.03125, %v3420_v45 }
0x1220   : > { %v3430_v12 = vadd.f32 1e-05, %v3426_v11 }
0x1221   : > { %v3423_v18 = vpop.xlane.xlu0 %3422 }
0x1222   : > { %4373 = vrsqrt.f32 %v3430_v12  ;;  %v3427_v46 = vmul.f32 0.03125, %v3423_v18 }
0x1224   : > { %v4370_v26 = vpop.eup %4369  ;;  %v3431_v27 = vadd.f32 1e-05, %v3427_v46 }
0x1225   : > { %v3436_v2 = vmul.f32 %v4370_v26, %v3404_v42 }
0x1226   : > { %4375 = vrsqrt.f32 %v3431_v27 }
0x1227   : > { %v3444_v36 = vmul.f32 %v3443_v14, %v3436_v2 }
0x1228   : > { %v4372_v19 = vpop.eup %4371 }
0x1229   : > { %v3452_v31 = vadd.f32 %v3801_v16, %v3444_v36  ;;  %v3437_v58 = vmul.f32 %v4372_v19, %v3405_v60 }
0x122b   : > { %v3456_v23 = vmul.f32 %v3452_v31, %v5096_v39  ;;  %v3445_v49 = vmul.f32 %v3443_v14, %v3437_v58 }
0x122c   : > { %v4374_v21 = vpop.eup %4373 }
0x122d   : > { %3460 = vst.msk [vmem:[#allocation2] sm:$0xff] %vm585_vm1, %v3456_v23  ;;  %v3453_v6 = vadd.f32 %v3801_v16, %v3445_v49  ;;  %v3438_v7 = vmul.f32 %v4374_v21, %v3406_v13 }
0x122f   : > { %v3457_v17 = vmul.f32 %v3453_v6, %v5112_v56  ;;  %v3446_v32 = vmul.f32 %v3443_v14, %v3438_v7  ;;  %v4383_v56 = vld [vmem:[%s5520_s4] sm:$0xff] (!%p3802_p3)  }
0x1230   : > { %v4376_v33 = vpop.eup %4375  ;;  %4029 = vmatprep.subr.bf16.mxu0 (!%p3802_p3), %v4383_v56 }
0x1231   : > { %3461 = vst.msk [vmem:[#allocation2 + $0x8] sm:$0xff] %vm585_vm1, %v3457_v17  ;;  %v3454_v63 = vadd.f32 %v3801_v16, %v3446_v32  ;;  %v3439_v55 = vmul.f32 %v4376_v33, %v3407_v10  ;;  %v3468_v28 = vpack.c.bf16 (!%p3802_p3), %v3457_v17, %v3456_v23  ;;  %4030 = vmatpush3.bf16.msra.mxu0 (!%p3802_p3), %v4383_v56 }
0x1233   : > { %v3458_v25 = vmul.f32 %v3454_v63, %v5114_v50  ;;  %v3447_v24 = vmul.f32 %v3443_v14, %v3439_v55  ;;  %3467 = sbr.rel (%p3802_p3) target bundleno = 4883 (0x1313), region = 76  ;;  %v4384_v50 = vld [vmem:[%s5520_s4 + $0x8] sm:$0xff] (!%p3802_p3)   ;;  %4033 = vmatprep.mubr.msk.bf16.mxu0 (!%p3802_p3), %vm585_vm1, %v3468_v28 }
0x1234   : > { %4031 = vmatprep.subr.bf16.mxu0 (!%p3802_p3), %v4384_v50 }
0x1235   : > { %3462 = vst.msk [vmem:[#allocation2 + $0x10] sm:$0xff] %vm585_vm1, %v3458_v25  ;;  %v3455_v39 = vadd.f32 %v3801_v16, %v3447_v24  ;;  %4032 = vmatpush3.bf16.msra.mxu0 (!%p3802_p3), %v4384_v50 }
0x1237   : > { %v3459_v57 = vmul.f32 %v3455_v39, %v5138_v0 }
0x1239   : > { %3463 = vst.msk [vmem:[#allocation2 + $0x18] sm:$0xff] %vm585_vm1, %v3459_v57  ;;  %v3469_v0 = vpack.c.bf16 (!%p3802_p3), %v3459_v57, %v3458_v25 }
0x123b   : > { %4034 = vmatmul.mubr.msk.bf16.vlgmr.msra.gmra.mrb[0].mxu0 %vm585_vm1, %v3469_v0 }
0x130e   : > { %v4035_v3 = vpop.f32.mrb[0].mxu0 }
0x130f   : > { %3543 = vst [vmem:[%s5526_s10 + $0x10] sm:$0xff] %v4035_v3  ;;  %v3526_v51 = vpop.f32.mrb[1].mxu0 }
0x1310   : > { %3541 = vst [vmem:[%s5526_s10] sm:$0xff] %v3526_v51  ;;  %v4036_v41 = vpop.f32.mrb[2].mxu0 }
0x1311   : > { %3544 = vst [vmem:[%s5526_s10 + $0x18] sm:$0xff] %v4036_v41  ;;  %v3529_v5 = vpop.f32.mrb[3].mxu0 }
0x1312   : > { %3542 = vst [vmem:[%s5526_s10 + $0x8] sm:$0xff] %v3529_v5 }
0x1313 PF: > { %s5540_s19 = sld [smem:[#allocation9_spill]]  ;;  %p23_p6 = scmp.ge.s32.totalorder %s4582_s18, 4  }
0x1314   : > { %s5541_s13 = smov %s4475_s14  ;;  %s5542_s14 = smov %s4479_s15 }
0x1315   : > { %s5544_s16 = smov %s4582_s18  ;;  %25 = sbr.rel (!%p23_p6) target bundleno = 7 (0x7), region = 126 }
0x1319   : > { %s5543_s15 = smov %s5540_s19 }
0x131c   :  { %3556 = vsyncpa [#allocation4], 1 }
0x131d   :  { %3558 = vsyncpa [#allocation4 + $0x1], 1 }
0x131e   :  { %3559 = vsyncpa [#allocation6], 1 }
0x131f   :  { %3561 = vsyncpa [#allocation6 + $0x1], 1 }

</bundles_post_ra>
